<compile_context>
chip_gen: v5e
topology: v5e:2x2
jax: 0.10.0
libtpu: 0.0.40
codegen_flags: <defaults>
</compile_context>

<pallas_src>
import numpy as np
import jax
import jax.numpy as jnp
from jax.experimental import pallas as pl
from jax.experimental.pallas import tpu as pltpu

# --- problem constants (mirror the PyTorch script) ---------------------------
X0 = 0.0
X1 = 4.0
L = X1 - X0
M_FOURIER = 5
HIDDEN_DIM = 50
INPUT_DIM = 2 * M_FOURIER + 1 + 1        # 12: [t, ones, cos x5, sin x5]
LAYERS = 5                               # -> 4 gated Z layers
OUTPUT_DIM = 1
LZ = LAYERS - 1

# Padded / packed sizes used inside the kernel (zero padding -> identical math).
H_PAD = 64                               # 50 -> 64 (multiple of 8 sublanes)
FEAT_ROWS = 1 + 2 * M_FOURIER            # 11 live embedded-input rows (ones folded into bias)
IN_PAD = 16                              # 11 -> 16

_TWO_PI_OVER_L = float(2.0 * np.pi / L)
_HALF_PI = float(np.pi / 2.0)

# Used only by the pure-JAX reference.
_FOURIER_OMEGAS = jnp.asarray(
    np.arange(1, M_FOURIER + 1, dtype=np.float32)[None, :] * 2.0 * np.pi / L
)


# --- Pallas kernel -------------------------------------------------------------
def _build_kernel(lane_chunk):
    """Kernel closure over the static lane sub-chunk width."""

    def kernel(
        x_ref,        # (2, TM)              rows: [t ; x]  (batch on lanes)
        wuvi_ref,     # (3*H_PAD, IN_PAD)    fused [Wu; Wv; Wi]^T (ones col removed), zero-padded
        buvi_ref,     # (3*H_PAD, 1)         biases with ones-column folded in
        wz_ref,       # (LZ, H_PAD, H_PAD)   each Wz^T, zero-padded
        bz_ref,       # (LZ, H_PAD, 1)
        wf_ref,       # (H_PAD, 1)           final-layer weights as a column
        bf_ref,       # (OUTPUT_DIM, 1)
        o_ref,        # (OUTPUT_DIM, TM)     lane-dense output
        xe_ref,       # scratch (IN_PAD, TM)
        uvh_ref,      # scratch (3*H_PAD, TM)
    ):
        tm = x_ref.shape[1]
        t = x_ref[0:1, :]                                   # (1, TM)
        xs = x_ref[1:2, :]                                  # (1, TM)

        # Fourier features in one EUP pass: rows 0..4 = cos(k*w*x), rows 5..9 = sin(k*w*x)
        # via sin(theta + pi/2) == cos(theta).  Built from iota -> no captured constants.
        ridx = jax.lax.broadcasted_iota(jnp.int32, (2 * M_FOURIER, tm), 0)
        is_cos = ridx < M_FOURIER
        k = jnp.where(is_cos, ridx, ridx - M_FOURIER).astype(jnp.float32) + 1.0
        phase = jnp.where(is_cos, jnp.float32(_HALF_PI), jnp.float32(0.0))
        cs = jnp.sin(xs * (k * jnp.float32(_TWO_PI_OVER_L)) + phase)   # (2M, TM)

        # Embedded input in VMEM scratch. Pad rows re-zeroed every step so the
        # kernel is correct even when the grid is split across TensorCores.
        xe_ref[0:1, :] = t
        xe_ref[1:FEAT_ROWS, :] = cs
        xe_ref[FEAT_ROWS:, :] = jnp.zeros((IN_PAD - FEAT_ROWS, tm), jnp.float32)

        # Fused input projection for U / V / H (single MXU pass over the tile).
        uvh_ref[...] = jnp.tanh(
            jnp.dot(wuvi_ref[...], xe_ref[...], preferred_element_type=jnp.float32)
            + buvi_ref[...]
        )

        wf_col = wf_ref[...]                                # (H_PAD, 1)
        bf = bf_ref[...]                                    # (1, 1)

        # Lane sub-chunked gated layers: u/d/h stay resident in vregs per chunk.
        n_chunks = tm // lane_chunk
        for c in range(n_chunks):
            c0 = c * lane_chunk
            c1 = c0 + lane_chunk
            u = uvh_ref[0:H_PAD, c0:c1]                     # (H_PAD, CH)
            v = uvh_ref[H_PAD:2 * H_PAD, c0:c1]
            h = uvh_ref[2 * H_PAD:3 * H_PAD, c0:c1]
            d = v - u                                       # h = u + z*d == (1-z)*u + z*v
            for l in range(LZ):
                z = jnp.tanh(
                    jnp.dot(wz_ref[l], h, preferred_element_type=jnp.float32)
                    + bz_ref[l]
                )
                h = u + z * d
            # Final projection as VPU mul + sublane reduction (skips a 1-row MXU dot).
            o_ref[:, c0:c1] = (
                jnp.sum(wf_col * h, axis=0, keepdims=True) + bf
            ).astype(o_ref.dtype)

    return kernel


# --- parameter packing ----------------------------------------------------------
def _round_up(x, m):
    return ((x + m - 1) // m) * m


def pack_params(p):
    """Transpose, fold the 'ones' feature into the bias, zero-pad and fuse params."""
    dh = H_PAD - HIDDEN_DIM

    def pack_in(w, b):
        wT = w.T                                            # (H, 12): cols [t, 1, cos x5, sin x5]
        b_fused = b.T + wT[:, 1:2]                          # fold ones column into bias (exact math)
        w_feat = jnp.concatenate([wT[:, 0:1], wT[:, 2:INPUT_DIM]], axis=1)   # (H, 11)
        w_pad = jnp.pad(w_feat, ((0, dh), (0, IN_PAD - FEAT_ROWS)))          # (H_PAD, IN_PAD)
        b_pad = jnp.pad(b_fused, ((0, dh), (0, 0)))                          # (H_PAD, 1)
        return w_pad, b_pad

    wu, bu = pack_in(p["wu"], p["bu"])
    wv, bv = pack_in(p["wv"], p["bv"])
    wi, bi = pack_in(p["wi"], p["bi"])
    wuvi = jnp.concatenate([wu, wv, wi], axis=0)            # (3*H_PAD, IN_PAD)
    buvi = jnp.concatenate([bu, bv, bi], axis=0)            # (3*H_PAD, 1)
    wz = jnp.pad(jnp.swapaxes(p["wz"], 1, 2), ((0, 0), (0, dh), (0, dh)))    # (LZ, H_PAD, H_PAD)
    bz = jnp.pad(jnp.swapaxes(p["bz"], 1, 2), ((0, 0), (0, dh), (0, 0)))     # (LZ, H_PAD, 1)
    wf = jnp.pad(p["wf"], ((0, dh), (0, 0)))                # (H_PAD, OUTPUT_DIM) column
    bf = p["bf"]                                            # (1, OUTPUT_DIM)
    return dict(wuvi=wuvi, buvi=buvi, wz=wz, bz=bz, wf=wf, bf=bf)


# --- wrapper ---------------------------------------------------------------------
def _tpu_generation():
    try:
        kind = jax.devices()[0].device_kind.lower()
    except Exception:
        return "unknown"
    if "v5 lite" in kind or "v5lite" in kind or "v5e" in kind:
        return "v5e"
    if "v7" in kind or "7x" in kind:
        return "v7x"
    if "v6" in kind:
        return "v6e"
    return "unknown"


def modified_mlp_forward(X, packed, *, tm=2048, lane_chunk=None):
    """X: (N, 2) float32 -> (N, 1) float32."""
    N = X.shape[0]
    gen = _tpu_generation()
    if lane_chunk is None:
        # 128-lane chunks on v5e (single vst slot), 256 elsewhere.
        lane_chunk = 128 if gen == "v5e" else 256
    two_tc = gen == "v7x"

    tm_cap = _round_up(max(int(tm), lane_chunk), lane_chunk)
    if two_tc and N > lane_chunk:
        # v7x megacore: aim for an even number of grid steps so both TCs get work.
        tm_eff = min(tm_cap, max(lane_chunk, _round_up((N + 1) // 2, lane_chunk)))
    else:
        # Single TensorCore: one grid step when the batch fits a tile.
        tm_eff = min(tm_cap, _round_up(N, lane_chunk))
    n_tiles = (N + tm_eff - 1) // tm_eff
    if two_tc and n_tiles > 1 and n_tiles % 2 == 1:
        n_tiles += 1
    n_pad = n_tiles * tm_eff

    xt = X.T.astype(jnp.float32)                            # (2, N): batch on lanes
    if n_pad != N:
        xt = jnp.pad(xt, ((0, 0), (0, n_pad - N)))

    const2 = lambda i: (0, 0)
    const3 = lambda i: (0, 0, 0)

    weight_bytes = 4 * sum(int(np.prod(v.shape)) for v in packed.values())
    cost = pl.CostEstimate(
        flops=int((2 * 3 * H_PAD * IN_PAD + LZ * 2 * H_PAD * H_PAD + 2 * H_PAD) * n_pad),
        transcendentals=int((3 * H_PAD + LZ * H_PAD + 2 * M_FOURIER) * n_pad),
        bytes_accessed=int(12 * n_pad + weight_bytes),
    )

    out = pl.pallas_call(
        _build_kernel(lane_chunk),
        out_shape=jax.ShapeDtypeStruct((OUTPUT_DIM, n_pad), jnp.float32),
        grid_spec=pltpu.PrefetchScalarGridSpec(
            num_scalar_prefetch=0,
            grid=(n_pad // tm_eff,),
            in_specs=[
                pl.BlockSpec((2, tm_eff), lambda i: (0, i)),
                # Weights/biases: constant block index -> fetched once per core.
                pl.BlockSpec((3 * H_PAD, IN_PAD), const2),
                pl.BlockSpec((3 * H_PAD, 1), const2),
                pl.BlockSpec((LZ, H_PAD, H_PAD), const3),
                pl.BlockSpec((LZ, H_PAD, 1), const3),
                pl.BlockSpec((H_PAD, OUTPUT_DIM), const2),
                pl.BlockSpec((1, OUTPUT_DIM), const2),
            ],
            out_specs=pl.BlockSpec((OUTPUT_DIM, tm_eff), lambda i: (0, i)),
            scratch_shapes=[
                pltpu.VMEM((IN_PAD, tm_eff), jnp.float32),        # xe
                pltpu.VMEM((3 * H_PAD, tm_eff), jnp.float32),     # fused u/v/h
            ],
        ),
        compiler_params=pltpu.CompilerParams(
            dimension_semantics=("parallel",)
        ),
        cost_estimate=cost,
    )(
        xt,
        packed["wuvi"], packed["buvi"],
        packed["wz"], packed["bz"],
        packed["wf"], packed["bf"],
    )

    return out[0, :N][:, None]                              # (N, 1)


# --- parameter init (PyTorch nn.Linear-style uniform, deterministic) -------------
def init_params(key):
    def linear(key, fan_in, fan_out):
        k1, k2 = jax.random.split(key)
        bound = 1.0 / np.sqrt(fan_in)
        w = jax.random.uniform(k1, (fan_in, fan_out), jnp.float32, -bound, bound)
        b = jax.random.uniform(k2, (1, fan_out), jnp.float32, -bound, bound)
        return w, b

    keys = jax.random.split(key, 4 + LZ)
    wu, bu = linear(keys[0], INPUT_DIM, HIDDEN_DIM)
    wv, bv = linear(keys[1], INPUT_DIM, HIDDEN_DIM)
    wi, bi = linear(keys[2], INPUT_DIM, HIDDEN_DIM)
    wf, bf = linear(keys[3], HIDDEN_DIM, OUTPUT_DIM)
    wz_list, bz_list = [], []
    for l in range(LZ):
        w, b = linear(keys[4 + l], HIDDEN_DIM, HIDDEN_DIM)
        wz_list.append(w)
        bz_list.append(b)
    return dict(
        wu=wu, bu=bu, wv=wv, bv=bv, wi=wi, bi=bi,
        wz=jnp.stack(wz_list, axis=0),                      # (LZ, H, H)
        bz=jnp.stack(bz_list, axis=0),                      # (LZ, 1, H)
        wf=wf, bf=bf,
    )


# --- pure-JAX reference for verification ------------------------------------------
def fourier_embedding(x):
    xw = x @ _FOURIER_OMEGAS
    return jnp.concatenate([jnp.ones_like(x), jnp.cos(xw), jnp.sin(xw)], axis=1)


def reference_forward(X, p):
    T = X[:, 0:1]
    FX = fourier_embedding(X[:, 1:])
    Xe = jnp.concatenate([T, FX], axis=1)
    u = jnp.tanh(Xe @ p["wu"] + p["bu"])
    v = jnp.tanh(Xe @ p["wv"] + p["bv"])
    h = jnp.tanh(Xe @ p["wi"] + p["bi"])
    for l in range(LZ):
        z = jnp.tanh(h @ p["wz"][l] + p["bz"][l])
        h = (1.0 - z) * u + z * v
    return h @ p["wf"] + p["bf"]


if __name__ == "__main__":
    key = jax.random.PRNGKey(0)
    k_param, k_x = jax.random.split(key)

    params = init_params(k_param)
    packed = pack_params(params)

    N = 200  # arbitrary batch of (t, x) collocation points (not a tile multiple)
    T_col = jax.random.uniform(jax.random.fold_in(k_x, 0), (N, 1), jnp.float32, 0.0, 1.0)
    X_col = jax.random.uniform(jax.random.fold_in(k_x, 1), (N, 1), jnp.float32, X0, X1)
    X = jnp.concatenate([T_col, X_col], axis=1)             # (N, 2)

    out = modified_mlp_forward(X, packed)
    out = jax.block_until_ready(out)

    ref = reference_forward(X, params)
    assert out.shape == (N, OUTPUT_DIM)
    # f32 everywhere; tolerance covers reordered accumulation (ones-fold, h=u+z*d, sin-phase cos).
    np.testing.assert_allclose(np.asarray(out), np.asarray(ref), rtol=1e-4, atol=2e-5)

    print("KERNEL_OK")
</pallas_src>

<mosaic_0001>
module attributes {stable_mosaic.version = 11 : i64} {
  func.func @kernel(%arg0: i32, %arg1: memref<2x256xf32, #tpu.memory_space<vmem>>, %arg2: memref<192x16xf32, #tpu.memory_space<vmem>>, %arg3: memref<192x1xf32, #tpu.memory_space<vmem>>, %arg4: memref<4x64x64xf32, #tpu.memory_space<vmem>>, %arg5: memref<4x64x1xf32, #tpu.memory_space<vmem>>, %arg6: memref<64x1xf32, #tpu.memory_space<vmem>>, %arg7: memref<1x1xf32, #tpu.memory_space<vmem>>, %arg8: memref<1x256xf32, #tpu.memory_space<vmem>>, %arg9: memref<16x256xf32, #tpu.memory_space<vmem>>, %arg10: memref<192x256xf32, #tpu.memory_space<vmem>>) attributes {dimension_semantics = [#tpu.dimension_semantics<parallel>], iteration_bounds = array<i64: 1>, scalar_prefetch = 0 : i64, scratch_operands = 2 : i64, tpu.core_type = #tpu.core_type<tc>, window_params = [{transform_indices = @transform_0, window_bounds = array<i64: 2, 256>}, {pipeline_mode = #tpu.pipeline_mode<synchronous>, transform_indices = @transform_1, window_bounds = array<i64: 192, 16>}, {pipeline_mode = #tpu.pipeline_mode<synchronous>, transform_indices = @transform_2, window_bounds = array<i64: 192, 1>}, {pipeline_mode = #tpu.pipeline_mode<synchronous>, transform_indices = @transform_3, window_bounds = array<i64: 4, 64, 64>}, {pipeline_mode = #tpu.pipeline_mode<synchronous>, transform_indices = @transform_4, window_bounds = array<i64: 4, 64, 1>}, {pipeline_mode = #tpu.pipeline_mode<synchronous>, transform_indices = @transform_5, window_bounds = array<i64: 64, 1>}, {pipeline_mode = #tpu.pipeline_mode<synchronous>, transform_indices = @transform_6, window_bounds = array<i64: 1, 1>}, {transform_indices = @transform_7, window_bounds = array<i64: 1, 256>}]} {
    %c0 = arith.constant 0 : index
    %c0_0 = arith.constant 0 : index
    %0 = vector.load %arg1[%c0, %c0_0] : memref<2x256xf32, #tpu.memory_space<vmem>>, vector<1x256xf32>
    %c1 = arith.constant 1 : index
    %c0_1 = arith.constant 0 : index
    %1 = vector.load %arg1[%c1, %c0_1] : memref<2x256xf32, #tpu.memory_space<vmem>>, vector<1x256xf32>
    %2 = tpu.iota {dimensions = array<i32: 0>} : vector<10x256xi32>
    %c5_i32 = arith.constant 5 : i32
    %3 = vector.broadcast %c5_i32 : i32 to vector<10x256xi32>
    %4 = arith.cmpi slt, %2, %3 : vector<10x256xi32>
    %c5_i32_2 = arith.constant 5 : i32
    %5 = vector.broadcast %c5_i32_2 : i32 to vector<10x256xi32>
    %6 = arith.subi %2, %5 : vector<10x256xi32>
    %7 = arith.select %4, %2, %6 : vector<10x256xi1>, vector<10x256xi32>
    %8 = arith.sitofp %7 : vector<10x256xi32> to vector<10x256xf32>
    %cst = arith.constant 1.000000e+00 : f32
    %9 = vector.broadcast %cst : f32 to vector<10x256xf32>
    %10 = arith.addf %8, %9 : vector<10x256xf32>
    %cst_3 = arith.constant 1.57079637 : f32
    %cst_4 = arith.constant 0.000000e+00 : f32
    %11 = vector.broadcast %cst_3 : f32 to vector<10x256xf32>
    %12 = vector.broadcast %cst_4 : f32 to vector<10x256xf32>
    %13 = arith.select %4, %11, %12 : vector<10x256xi1>, vector<10x256xf32>
    %cst_5 = arith.constant 1.57079637 : f32
    %14 = vector.broadcast %cst_5 : f32 to vector<10x256xf32>
    %15 = arith.mulf %10, %14 : vector<10x256xf32>
    %16 = vector.broadcast %1 : vector<1x256xf32> to vector<10x256xf32>
    %17 = arith.mulf %16, %15 : vector<10x256xf32>
    %18 = arith.addf %17, %13 : vector<10x256xf32>
    %19 = math.sin %18 : vector<10x256xf32>
    %c0_6 = arith.constant 0 : index
    %c0_7 = arith.constant 0 : index
    %20 = vector.load %arg9[%c0_6, %c0_7] : memref<16x256xf32, #tpu.memory_space<vmem>>, vector<1x256xf32>
    tpu.vector_store %arg9[%c0_6, %c0_7], %0 {strides = array<i32>} : memref<16x256xf32, #tpu.memory_space<vmem>>, vector<1x256xf32>,
    %c1_8 = arith.constant 1 : index
    %c0_9 = arith.constant 0 : index
    %21 = vector.load %arg9[%c1_8, %c0_9] : memref<16x256xf32, #tpu.memory_space<vmem>>, vector<10x256xf32>
    tpu.vector_store %arg9[%c1_8, %c0_9], %19 {strides = array<i32>} : memref<16x256xf32, #tpu.memory_space<vmem>>, vector<10x256xf32>,
    %cst_10 = arith.constant 0.000000e+00 : f32
    %22 = vector.broadcast %cst_10 : f32 to vector<5x256xf32>
    %c11 = arith.constant 11 : index
    %c0_11 = arith.constant 0 : index
    %23 = vector.load %arg9[%c11, %c0_11] : memref<16x256xf32, #tpu.memory_space<vmem>>, vector<5x256xf32>
    tpu.vector_store %arg9[%c11, %c0_11], %22 {strides = array<i32>} : memref<16x256xf32, #tpu.memory_space<vmem>>, vector<5x256xf32>,
    %c0_12 = arith.constant 0 : index
    %c0_13 = arith.constant 0 : index
    %24 = vector.load %arg2[%c0_12, %c0_13] : memref<192x16xf32, #tpu.memory_space<vmem>>, vector<192x16xf32>
    %c0_14 = arith.constant 0 : index
    %c0_15 = arith.constant 0 : index
    %25 = vector.load %arg9[%c0_14, %c0_15] : memref<16x256xf32, #tpu.memory_space<vmem>>, vector<16x256xf32>
    %cst_16 = arith.constant dense<0.000000e+00> : vector<192x256xf32>
    %26 = tpu.matmul %24, %25, %cst_16 {dimension_numbers = #tpu.dot_dimension_numbers<[1], [0], [0], [1], [0, 0, 1, 1], [], []>} : vector<192x16xf32>, vector<16x256xf32>, vector<192x256xf32> -> vector<192x256xf32>
    %c0_17 = arith.constant 0 : index
    %c0_18 = arith.constant 0 : index
    %27 = vector.load %arg3[%c0_17, %c0_18] : memref<192x1xf32, #tpu.memory_space<vmem>>, vector<192x1xf32>
    %28 = vector.broadcast %27 : vector<192x1xf32> to vector<192x256xf32>
    %29 = arith.addf %26, %28 : vector<192x256xf32>
    %30 = math.tanh %29 : vector<192x256xf32>
    %c0_19 = arith.constant 0 : index
    %c0_20 = arith.constant 0 : index
    %31 = vector.load %arg10[%c0_19, %c0_20] : memref<192x256xf32, #tpu.memory_space<vmem>>, vector<192x256xf32>
    tpu.vector_store %arg10[%c0_19, %c0_20], %30 {strides = array<i32>} : memref<192x256xf32, #tpu.memory_space<vmem>>, vector<192x256xf32>,
    %c0_21 = arith.constant 0 : index
    %c0_22 = arith.constant 0 : index
    %32 = vector.load %arg6[%c0_21, %c0_22] : memref<64x1xf32, #tpu.memory_space<vmem>>, vector<64x1xf32>
    %c0_23 = arith.constant 0 : index
    %c0_24 = arith.constant 0 : index
    %33 = vector.load %arg7[%c0_23, %c0_24] : memref<1x1xf32, #tpu.memory_space<vmem>>, vector<1x1xf32>
    %c0_25 = arith.constant 0 : index
    %c0_26 = arith.constant 0 : index
    %34 = vector.load %arg10[%c0_25, %c0_26] : memref<192x256xf32, #tpu.memory_space<vmem>>, vector<64x256xf32>
    %c64 = arith.constant 64 : index
    %c0_27 = arith.constant 0 : index
    %35 = vector.load %arg10[%c64, %c0_27] : memref<192x256xf32, #tpu.memory_space<vmem>>, vector<64x256xf32>
    %c128 = arith.constant 128 : index
    %c0_28 = arith.constant 0 : index
    %36 = vector.load %arg10[%c128, %c0_28] : memref<192x256xf32, #tpu.memory_space<vmem>>, vector<64x256xf32>
    %37 = arith.subf %35, %34 : vector<64x256xf32>
    %c0_29 = arith.constant 0 : index
    %c0_30 = arith.constant 0 : index
    %c0_31 = arith.constant 0 : index
    %38 = vector.load %arg4[%c0_29, %c0_30, %c0_31] : memref<4x64x64xf32, #tpu.memory_space<vmem>>, vector<1x64x64xf32>
    %39 = vector.shape_cast %38 : vector<1x64x64xf32> to vector<64x64xf32>
    %cst_32 = arith.constant dense<0.000000e+00> : vector<64x256xf32>
    %40 = tpu.matmul %39, %36, %cst_32 {dimension_numbers = #tpu.dot_dimension_numbers<[1], [0], [0], [1], [0, 0, 1, 1], [], []>} : vector<64x64xf32>, vector<64x256xf32>, vector<64x256xf32> -> vector<64x256xf32>
    %c0_33 = arith.constant 0 : index
    %c0_34 = arith.constant 0 : index
    %c0_35 = arith.constant 0 : index
    %41 = vector.load %arg5[%c0_33, %c0_34, %c0_35] : memref<4x64x1xf32, #tpu.memory_space<vmem>>, vector<1x64x1xf32>
    %42 = vector.shape_cast %41 : vector<1x64x1xf32> to vector<64x1xf32>
    %43 = vector.broadcast %42 : vector<64x1xf32> to vector<64x256xf32>
    %44 = arith.addf %40, %43 : vector<64x256xf32>
    %45 = math.tanh %44 : vector<64x256xf32>
    %46 = arith.mulf %45, %37 : vector<64x256xf32>
    %47 = arith.addf %34, %46 : vector<64x256xf32>
    %c1_36 = arith.constant 1 : index
    %c0_37 = arith.constant 0 : index
    %c0_38 = arith.constant 0 : index
    %48 = vector.load %arg4[%c1_36, %c0_37, %c0_38] : memref<4x64x64xf32, #tpu.memory_space<vmem>>, vector<1x64x64xf32>
    %49 = vector.shape_cast %48 : vector<1x64x64xf32> to vector<64x64xf32>
    %cst_39 = arith.constant dense<0.000000e+00> : vector<64x256xf32>
    %50 = tpu.matmul %49, %47, %cst_39 {dimension_numbers = #tpu.dot_dimension_numbers<[1], [0], [0], [1], [0, 0, 1, 1], [], []>} : vector<64x64xf32>, vector<64x256xf32>, vector<64x256xf32> -> vector<64x256xf32>
    %c1_40 = arith.constant 1 : index
    %c0_41 = arith.constant 0 : index
    %c0_42 = arith.constant 0 : index
    %51 = vector.load %arg5[%c1_40, %c0_41, %c0_42] : memref<4x64x1xf32, #tpu.memory_space<vmem>>, vector<1x64x1xf32>
    %52 = vector.shape_cast %51 : vector<1x64x1xf32> to vector<64x1xf32>
    %53 = vector.broadcast %52 : vector<64x1xf32> to vector<64x256xf32>
    %54 = arith.addf %50, %53 : vector<64x256xf32>
    %55 = math.tanh %54 : vector<64x256xf32>
    %56 = arith.mulf %55, %37 : vector<64x256xf32>
    %57 = arith.addf %34, %56 : vector<64x256xf32>
    %c2 = arith.constant 2 : index
    %c0_43 = arith.constant 0 : index
    %c0_44 = arith.constant 0 : index
    %58 = vector.load %arg4[%c2, %c0_43, %c0_44] : memref<4x64x64xf32, #tpu.memory_space<vmem>>, vector<1x64x64xf32>
    %59 = vector.shape_cast %58 : vector<1x64x64xf32> to vector<64x64xf32>
    %cst_45 = arith.constant dense<0.000000e+00> : vector<64x256xf32>
    %60 = tpu.matmul %59, %57, %cst_45 {dimension_numbers = #tpu.dot_dimension_numbers<[1], [0], [0], [1], [0, 0, 1, 1], [], []>} : vector<64x64xf32>, vector<64x256xf32>, vector<64x256xf32> -> vector<64x256xf32>
    %c2_46 = arith.constant 2 : index
    %c0_47 = arith.constant 0 : index
    %c0_48 = arith.constant 0 : index
    %61 = vector.load %arg5[%c2_46, %c0_47, %c0_48] : memref<4x64x1xf32, #tpu.memory_space<vmem>>, vector<1x64x1xf32>
    %62 = vector.shape_cast %61 : vector<1x64x1xf32> to vector<64x1xf32>
    %63 = vector.broadcast %62 : vector<64x1xf32> to vector<64x256xf32>
    %64 = arith.addf %60, %63 : vector<64x256xf32>
    %65 = math.tanh %64 : vector<64x256xf32>
    %66 = arith.mulf %65, %37 : vector<64x256xf32>
    %67 = arith.addf %34, %66 : vector<64x256xf32>
    %c3 = arith.constant 3 : index
    %c0_49 = arith.constant 0 : index
    %c0_50 = arith.constant 0 : index
    %68 = vector.load %arg4[%c3, %c0_49, %c0_50] : memref<4x64x64xf32, #tpu.memory_space<vmem>>, vector<1x64x64xf32>
    %69 = vector.shape_cast %68 : vector<1x64x64xf32> to vector<64x64xf32>
    %cst_51 = arith.constant dense<0.000000e+00> : vector<64x256xf32>
    %70 = tpu.matmul %69, %67, %cst_51 {dimension_numbers = #tpu.dot_dimension_numbers<[1], [0], [0], [1], [0, 0, 1, 1], [], []>} : vector<64x64xf32>, vector<64x256xf32>, vector<64x256xf32> -> vector<64x256xf32>
    %c3_52 = arith.constant 3 : index
    %c0_53 = arith.constant 0 : index
    %c0_54 = arith.constant 0 : index
    %71 = vector.load %arg5[%c3_52, %c0_53, %c0_54] : memref<4x64x1xf32, #tpu.memory_space<vmem>>, vector<1x64x1xf32>
    %72 = vector.shape_cast %71 : vector<1x64x1xf32> to vector<64x1xf32>
    %73 = vector.broadcast %72 : vector<64x1xf32> to vector<64x256xf32>
    %74 = arith.addf %70, %73 : vector<64x256xf32>
    %75 = math.tanh %74 : vector<64x256xf32>
    %76 = arith.mulf %75, %37 : vector<64x256xf32>
    %77 = arith.addf %34, %76 : vector<64x256xf32>
    %78 = vector.broadcast %32 : vector<64x1xf32> to vector<64x256xf32>
    %79 = arith.mulf %78, %77 : vector<64x256xf32>
    %cst_55 = arith.constant dense<0.000000e+00> : vector<256xf32>
    %80 = vector.multi_reduction <add>, %79, %cst_55 [0] : vector<64x256xf32> to vector<256xf32>
    %81 = vector.shape_cast %80 : vector<256xf32> to vector<1x256xf32>
    %82 = vector.broadcast %33 : vector<1x1xf32> to vector<1x256xf32>
    %83 = arith.addf %81, %82 : vector<1x256xf32>
    %c0_56 = arith.constant 0 : index
    %c0_57 = arith.constant 0 : index
    %84 = vector.load %arg8[%c0_56, %c0_57] : memref<1x256xf32, #tpu.memory_space<vmem>>, vector<1x256xf32>
    tpu.vector_store %arg8[%c0_56, %c0_57], %83 {strides = array<i32>} : memref<1x256xf32, #tpu.memory_space<vmem>>, vector<1x256xf32>,
    return
  }
  func.func @transform_0(%arg0: i32) -> (i32, i32) {
    %c0_i32 = arith.constant 0 : i32
    %c0_i32_0 = arith.constant 0 : i32
    return %c0_i32, %arg0 : i32, i32
  }
  func.func @transform_1(%arg0: i32) -> (i32, i32) {
    %c0_i32 = arith.constant 0 : i32
    %c0_i32_0 = arith.constant 0 : i32
    %c0_i32_1 = arith.constant 0 : i32
    return %c0_i32, %c0_i32_0 : i32, i32
  }
  func.func @transform_2(%arg0: i32) -> (i32, i32) {
    %c0_i32 = arith.constant 0 : i32
    %c0_i32_0 = arith.constant 0 : i32
    %c0_i32_1 = arith.constant 0 : i32
    return %c0_i32, %c0_i32_0 : i32, i32
  }
  func.func @transform_3(%arg0: i32) -> (i32, i32, i32) {
    %c0_i32 = arith.constant 0 : i32
    %c0_i32_0 = arith.constant 0 : i32
    %c0_i32_1 = arith.constant 0 : i32
    %c0_i32_2 = arith.constant 0 : i32
    return %c0_i32, %c0_i32_0, %c0_i32_1 : i32, i32, i32
  }
  func.func @transform_4(%arg0: i32) -> (i32, i32, i32) {
    %c0_i32 = arith.constant 0 : i32
    %c0_i32_0 = arith.constant 0 : i32
    %c0_i32_1 = arith.constant 0 : i32
    %c0_i32_2 = arith.constant 0 : i32
    return %c0_i32, %c0_i32_0, %c0_i32_1 : i32, i32, i32
  }
  func.func @transform_5(%arg0: i32) -> (i32, i32) {
    %c0_i32 = arith.constant 0 : i32
    %c0_i32_0 = arith.constant 0 : i32
    %c0_i32_1 = arith.constant 0 : i32
    return %c0_i32, %c0_i32_0 : i32, i32
  }
  func.func @transform_6(%arg0: i32) -> (i32, i32) {
    %c0_i32 = arith.constant 0 : i32
    %c0_i32_0 = arith.constant 0 : i32
    %c0_i32_1 = arith.constant 0 : i32
    return %c0_i32, %c0_i32_0 : i32, i32
  }
  func.func @transform_7(%arg0: i32) -> (i32, i32) {
    %c0_i32 = arith.constant 0 : i32
    %c0_i32_0 = arith.constant 0 : i32
    return %c0_i32, %arg0 : i32, i32
  }
}

</mosaic_0001>

<bundles_post_ra>
// kernel: tpu_custom_call.1
= control target key start
LH: loop header
LB: loop body
LE: loop exit
PB: predicated region body
PF: predicated region fallthrough
CT: control target
= control target key end

     0   :  { %s4200_s0 = inlined_call_operand.vmem [shape: f32[2,256], index: 0, kind: input, shape index: {}]   ;;  %s4201_s1 = inlined_call_operand.vmem [shape: f32[192,16], index: 1, kind: input, shape index: {}]   ;;  %s4202_s2 = inlined_call_operand.vmem [shape: f32[192,1], index: 2, kind: input, shape index: {}]   ;;  %s4203_s3 = inlined_call_operand.vmem [shape: f32[4,64,64], index: 3, kind: input, shape index: {}]   ;;  %s4204_s4 = inlined_call_operand.vmem [shape: f32[4,64,1], index: 4, kind: input, shape index: {}]   ;;  %s4205_s5 = inlined_call_operand.vmem [shape: f32[64,1], index: 5, kind: input, shape index: {}]   ;;  %s4206_s6 = inlined_call_operand.<no memory space> [shape: f32[1,1], index: 6, kind: input, shape index: {}]   ;;  %s4207_s7 = inlined_call_operand.hbm [shape: f32[1,256], index: 7, kind: output, shape index: {}]  }
   0x1   :  { %v12_v0 = vstv %s4206_s6 }
   0x2   :  { %13 = vst [vmem:[#allocation4] sm:$0x1] %v12_v0 }
   0x3   :  { %v758_v1 = vld [vmem:[%s4202_s2 + $0xa8] sm:$0xff]  ;;  %v32_v2 = vlaneseq  ;;  %v2709_v3 = vmov 0   ;;  %v2260_v7 = vld [vmem:[%s4200_s0 + $0x1] ss:$2 sm:$0x3]  ;;  %v2710_v8 = vmov 0.0  }
   0x4   :  { %2457 = vset.pattern.permute.xlu1 %v2709_v3  ;;  %2456 = vset.pattern.permute.xlu0 %v2709_v3  ;;  %707 = vst [vmem:[#allocation2 + $0x10] sm:$0xf8] %v2710_v8 }
   0x5   :  { %868 = vperm.xlu1 %2457, %v758_v1   ;;  %v33_v4 = vshrl.u32 %v32_v2, 7  ;;  %2458 = vset.pattern.permute.xlu2 %v2709_v3  ;;  %708 = vst [vmem:[#allocation2 + $0x18] sm:$0xf8] %v2710_v8 }
   0x7   :  { %v34_v5 = vadd.s32 8, %v33_v4  ;;  %vm35_vm0 = vcmp.lt.s32.totalorder %v33_v4, 5  ;;  %v2261_v6 = vadd.s32 4294967291, %v33_v4 }
   0x9   :  { %v2262_v9 = vadd.s32 4294967291, %v34_v5  ;;  %v39_v10 = vsel %vm35_vm0, %v33_v4, %v2261_v6 }
   0xa   :  { %14 = vsyncpa [#allocation6], 0  ;;  %v757_v11 = vld [vmem:[%s4202_s2 + $0xa0] sm:$0xff]  ;;  %v41_v12 = vcvt.s32.f32 %v39_v10  ;;  %v50_v15 = vperm.slane %v2260_v7, 0  ;;  %v51_v16 = vperm.slane %v2260_v7, 1  ;;  %v760_v31 = vld [vmem:[%s4202_s2 + $0xb8] sm:$0xff] }
   0xb   :  { %v42_v13 = vcvt.s32.f32 %v2262_v9  ;;  %v45_v19 = vsel %vm35_vm0, 1.5707964, %v2710_v8  ;;  %v753_v25 = vld [vmem:[%s4202_s2 + $0x80] sm:$0xff]  ;;  %878 = vperm.xlu0 %2456, %v760_v31   ;;  %v743_v39 = vld [vmem:[%s4202_s2 + $0x30] sm:$0xff]  ;;  %v2711_v53 = vmov 683565275  }
   0xc   :  { %v43_v14 = vadd.f32 1.0, %v41_v12  ;;  %v2712_v55 = vmov 2475754826   ;;  %v2713_v57 = vmov 2131351028   ;;  %v742_v1 = vld [vmem:[%s4202_s2 + $0x28] sm:$0xff] }
   0xd   :  { %863 = vperm.xlu1 %2457, %v757_v11   ;;  %v44_v17 = vadd.f32 1.0, %v42_v13  ;;  %v2714_v59 = vmov 2102212464   ;;  %v2715_v61 = vmov 920167782   ;;  %s2251_s10 = sshll.u32 %s4207_s7, 4  ;;  %s2252_s10 = int_to_ptr.hbm [resolvable:$true] %s2251_s10 }
   0xe   :  { %v47_v18 = vmul.f32 1.5707964, %v43_v14  ;;  %v2716_v8 = vmov 1326507024  }
   0xf   :  { %v48_v20 = vmul.f32 1.5707964, %v44_v17 }
  0x10   :  { %v54_v21 = vmul.f32 %v50_v15, %v47_v18  ;;  %v55_v22 = vmul.f32 %v51_v16, %v47_v18 }
  0x11   :  { %v2776_v23 = vmul.f32 %v50_v15, %v48_v20  ;;  %v2778_v24 = vmul.f32 %v51_v16, %v48_v20 }
  0x12   :  { %v2783_v26 = vadd.f32 %v54_v21, %v45_v19  ;;  %v2785_v27 = vadd.f32 %v55_v22, %v45_v19 }
  0x13   :  { %v375_v28 = vand.u32 2139095040, %v2776_v23  ;;  %v372_v38 = vand.u32 2147483647, %v2776_v23  ;;  %v530_v43 = vand.u32 2139095040, %v2778_v24 }
  0x14   :  { %v65_v29 = vand.u32 2139095040, %v2783_v26  ;;  %v220_v30 = vand.u32 2139095040, %v2785_v27  ;;  %v62_v32 = vand.u32 2147483647, %v2783_v26 }
  0x15   :  { %843 = vperm.xlu1 %2457, %v753_v25   ;;  %v376_v34 = vshrl.u32 %v375_v28, 23  ;;  %v379_v46 = vand.u32 8388607, %v372_v38  ;;  %v531_v51 = vshrl.u32 %v530_v43, 23 }
  0x16   :  { %v66_v33 = vshrl.u32 %v65_v29, 23  ;;  %v221_v35 = vshrl.u32 %v220_v30, 23  ;;  %v69_v37 = vand.u32 8388607, %v62_v32 }
  0x17   :  { %v2269_v41 = vadd.s32 4294967169, %v376_v34  ;;  %v380_v0 = vor.u32 8388608, %v379_v46 }
  0x18   :  { %v2263_v36 = vadd.s32 4294967169, %v66_v33  ;;  %v2266_v42 = vadd.s32 4294967169, %v221_v35  ;;  %v70_v44 = vor.u32 8388608, %v69_v37 }
  0x19   :  { %v382_v48 = vadd.s32 1, %v2269_v41  ;;  %v2836_v43 = vshll.u32 %v380_v0, 8 }
  0x1a   :  { %v72_v40 = vadd.s32 1, %v2263_v36  ;;  %v227_v50 = vadd.s32 1, %v2266_v42  ;;  %v2808_v63 = vshll.u32 %v70_v44, 8  ;;  %v741_v36 = vld [vmem:[%s4202_s2 + $0x20] sm:$0xff]  ;;  %v2838_v44 = vadd.s32 4294967169, %v531_v51 }
  0x1b   :  { %vm383_vm2 = vcmp.gt.s32.totalorder %v382_v48, 0 }
  0x1c   :  { %vm73_vm1 = vcmp.gt.s32.totalorder %v72_v40, 0  ;;  %vm228_vm4 = vcmp.gt.s32.totalorder %v227_v50, 0  ;;  %v111_v21 = vand.u32 65535, %v2808_v63  ;;  %v112_v22 = vshrl.u32 %v2808_v63, 16 }
  0x1d   :  { %793 = vperm.xlu1 %2457, %v743_v39   ;;  %v74_v45 = vsel %vm73_vm1, %v72_v40, 0  ;;  %v2824_v29 = vsel %vm228_vm4, %v227_v50, 0  ;;  %v384_v30 = vsel %vm383_vm2, %v382_v48, 0 }
  0x1e   :  { %v76_v47 = vand.u32 31, %v74_v45  ;;  %v75_v49 = vshrl.u32 %v74_v45, 5  ;;  %v2834_v42 = vand.u32 31, %v2824_v29 }
  0x20   :  { %v77_v52 = vsub.s32 32, %v76_v47  ;;  %v79_v54 = vshll.u32 %v2711_v53, %v76_v47  ;;  %v82_v56 = vshll.u32 %v2712_v55, %v76_v47  ;;  %v85_v58 = vshll.u32 %v2713_v57, %v76_v47 }
  0x21   :  { %v88_v60 = vshll.u32 %v2714_v59, %v76_v47  ;;  %v91_v62 = vshll.u32 %v2715_v61, %v76_v47  ;;  %vm94_vm3 = vcmp.lt.s32.totalorder %v75_v49, 1  ;;  %vm97_vm5 = vcmp.lt.s32.totalorder %v75_v49, 4 }
  0x22   :  { %v80_v4 = vshrl.u32 %v2712_v55, %v77_v52  ;;  %v83_v5 = vshrl.u32 %v2713_v57, %v77_v52  ;;  %v86_v6 = vshrl.u32 %v2714_v59, %v77_v52  ;;  %v89_v7 = vshrl.u32 %v2715_v61, %v77_v52 }
  0x23   :  { %v92_v9 = vshrl.u32 %v2716_v8, %v77_v52  ;;  %v78_v13 = vshrl.u32 %v2711_v53, %v77_v52  ;;  %vm96_vm6 = vcmp.lt.s32.totalorder %v75_v49, 3  ;;  %vm95_vm7 = vcmp.lt.s32.totalorder %v75_v49, 2 }
  0x24   :  { %v81_v10 = vor.u32 %v80_v4, %v79_v54  ;;  %v84_v11 = vor.u32 %v83_v5, %v82_v56  ;;  %v87_v12 = vor.u32 %v86_v6, %v85_v58  ;;  %v90_v14 = vor.u32 %v89_v7, %v88_v60 }
  0x25   :  { %788 = vperm.xlu1 %2457, %v742_v1   ;;  %v93_v15 = vor.u32 %v92_v9, %v91_v62  ;;  %v386_v56 = vand.u32 31, %v384_v30  ;;  %v2843_v1 = vshrl.u32 %v384_v30, 5 }
  0x26   :  { %v99_v16 = vsel %vm97_vm5, %v87_v12, 2102212464  ;;  %v102_v17 = vsel %vm94_vm3, %v81_v10, %v84_v11  ;;  %v106_v18 = vsel %vm94_vm3, %v84_v11, %v87_v12  ;;  %v103_v19 = vsel %vm97_vm5, %v90_v14, 920167782 }
  0x27   :  { %v107_v20 = vsel %vm97_vm5, %v93_v15, 1326507024  ;;  %v104_v25 = vsel %vm96_vm6, %v87_v12, %v103_v19  ;;  %v98_v31 = vsel %vm94_vm3, %v78_v13, %v81_v10  ;;  %v100_v33 = vsel %vm96_vm6, %v84_v11, %v99_v16  ;;  %v740_v12 = vld [vmem:[%s4202_s2 + $0x18] sm:$0xff] }
  0x28   :  { %v108_v28 = vsel %vm96_vm6, %v90_v14, %v107_v20  ;;  %v105_v34 = vsel %vm95_vm7, %v102_v17, %v104_v25  ;;  %v2841_v45 = vsel %vm95_vm7, %v98_v31, %v100_v33  ;;  %v2846_v11 = vsub.s32 32, %v386_v56 }
  0x29   :  { %v109_v35 = vsel %vm95_vm7, %v106_v18, %v108_v28  ;;  %v135_v40 = vand.u32 65535, %v105_v34  ;;  %v136_v41 = vshrl.u32 %v105_v34, 16  ;;  %v389_v15 = vshll.u32 %v2711_v53, %v386_v56 }
  0x2a   :  { %v113_v37 = vand.u32 65535, %v109_v35  ;;  %v114_v39 = vshrl.u32 %v109_v35, 16  ;;  %v392_v28 = vshll.u32 %v2712_v55, %v386_v56  ;;  %v393_v30 = vshrl.u32 %v2713_v57, %v2846_v11 }
  0x2b   :  { %v137_v50 = vmul.u32 %v135_v40, %v111_v21  ;;  %v138_v52 = vmul.u32 %v136_v41, %v111_v21  ;;  %v139_v54 = vmul.u32 %v135_v40, %v112_v22  ;;  %v140_v4 = vmul.u32 %v136_v41, %v112_v22 }
  0x2c   :  { %v115_v46 = vmul.u32 %v113_v37, %v111_v21  ;;  %v116_v47 = vmul.u32 %v114_v39, %v111_v21  ;;  %v117_v48 = vmul.u32 %v113_v37, %v112_v22  ;;  %v118_v58 = vmul.u32 %v114_v39, %v112_v22 }
  0x2d   :  { %783 = vperm.xlu1 %2457, %v741_v36   ;;  %v141_v51 = vshll.u32 %v138_v52, 16  ;;  %v143_v5 = vshll.u32 %v139_v54, 16  ;;  %v142_v7 = vshrl.u32 %v138_v52, 16  ;;  %v144_v17 = vshrl.u32 %v139_v54, 16 }
  0x2e   :  { %v119_v60 = vshll.u32 %v116_v47, 16  ;;  %v121_v62 = vshll.u32 %v117_v48, 16  ;;  %v120_v0 = vshrl.u32 %v116_v47, 16  ;;  %v122_v49 = vshrl.u32 %v117_v48, 16 }
  0x2f   :  { %vm145_vm9 = vc.u32 %v137_v50, %v141_v51  ;;  %v147_v10 = vadd.s32 %v141_v51, %v137_v50  ;;  %v390_v22 = vshrl.u32 %v2712_v55, %v2846_v11  ;;  %v395_v31 = vshll.u32 %v2713_v57, %v386_v56 }
  0x30   :  { %vm123_vm8 = vc.u32 %v115_v46, %v119_v60  ;;  %v125_v6 = vadd.s32 %v119_v60, %v115_v46  ;;  %v146_v14 = vsel %vm145_vm9, 1, %v2709_v3  ;;  %v396_v35 = vshrl.u32 %v2714_v59, %v2846_v11 }
  0x31   :  { %v124_v9 = vsel %vm123_vm8, 1, %v2709_v3  ;;  %v148_v18 = vadd.s32 %v146_v14, %v140_v4  ;;  %vm149_vm11 = vc.u32 %v147_v10, %v143_v5  ;;  %v2855_v21 = vadd.s32 %v147_v10, %v143_v5 }
  0x32   :  { %v126_v13 = vadd.s32 %v124_v9, %v118_v58  ;;  %vm127_vm10 = vc.u32 %v125_v6, %v121_v62  ;;  %v150_v20 = vsel %vm149_vm11, 1, %v2709_v3  ;;  %v2863_v34 = vor.u32 %v390_v22, %v389_v15 }
  0x33   :  { %v128_v16 = vsel %vm127_vm10, 1, %v2709_v3  ;;  %v152_v25 = vadd.s32 %v150_v20, %v148_v18  ;;  %v398_v36 = vshll.u32 %v2714_v59, %v386_v56  ;;  %v2868_v39 = vor.u32 %v393_v30, %v392_v28 }
  0x34   :  { %v130_v19 = vadd.s32 %v128_v16, %v126_v13  ;;  %v399_v40 = vshrl.u32 %v2715_v61, %v2846_v11  ;;  %v401_v41 = vshll.u32 %v2715_v61, %v386_v56  ;;  %v397_v47 = vor.u32 %v396_v35, %v395_v31  ;;  %v739_v56 = vld [vmem:[%s4202_s2 + $0x10] sm:$0xff] }
  0x35   :  { %778 = vperm.xlu1 %2457, %v740_v12   ;;  %v153_v37 = vadd.s32 %v152_v25, %v142_v7  ;;  %v402_v48 = vshrl.u32 %v2716_v8, %v2846_v11  ;;  %vm404_vm12 = vcmp.lt.s32.totalorder %v2843_v1, 1  ;;  %v155_v52 = vmul.u32 %v2808_v63, %v2841_v45 }
  0x36   :  { %v131_v33 = vadd.s32 %v130_v19, %v120_v0  ;;  %v2881_v54 = vsub.s32 32, %v2834_v42  ;;  %v400_v58 = vor.u32 %v399_v40, %v398_v36  ;;  %vm406_vm14 = vcmp.lt.s32.totalorder %v2843_v1, 3 }
  0x37   :  { %v154_v50 = vadd.s32 %v153_v37, %v144_v17  ;;  %v403_v60 = vor.u32 %v402_v48, %v401_v41  ;;  %vm407_vm15 = vcmp.lt.s32.totalorder %v2843_v1, 4  ;;  %v2891_v0 = vshrl.u32 %v2824_v29, 5 }
  0x38   :  { %v2873_v46 = vadd.s32 %v131_v33, %v122_v49  ;;  %vm405_vm0 = vcmp.lt.s32.totalorder %v2843_v1, 2  ;;  %v412_v63 = vsel %vm404_vm12, %v2863_v34, %v2868_v39  ;;  %v243_v45 = vshll.u32 %v2714_v59, %v2834_v42 }
  0x39   :  { %v158_v62 = vadd.s32 1, %v154_v50  ;;  %v413_v4 = vsel %vm407_vm15, %v400_v58, 920167782  ;;  %v416_v51 = vsel %vm404_vm12, %v2868_v39, %v397_v47  ;;  %v417_v29 = vsel %vm407_vm15, %v403_v60, 1326507024 }
  0x3a   :  { %vm157_vm13 = vc.u32 %v2873_v46, %v2855_v21  ;;  %v244_v49 = vshrl.u32 %v2715_v61, %v2881_v54  ;;  %v414_v6 = vsel %vm406_vm14, %v397_v47, %v413_v4  ;;  %v418_v7 = vsel %vm406_vm14, %v400_v58, %v417_v29 }
  0x3b   :  { %v159_v5 = vsel %vm157_vm13, %v158_v62, %v154_v50  ;;  %v415_v10 = vsel %vm405_vm0, %v412_v63, %v414_v6  ;;  %v419_v12 = vsel %vm405_vm0, %v416_v51, %v418_v7  ;;  %v421_v13 = vand.u32 65535, %v2836_v43 }
  0x3c   :  { %v160_v9 = vadd.s32 %v159_v5, %v155_v52  ;;  %v422_v14 = vshrl.u32 %v2836_v43, 16  ;;  %v423_v15 = vand.u32 65535, %v419_v12  ;;  %v424_v16 = vshrl.u32 %v419_v12, 16 }
  0x3d   :  { %773 = vperm.xlu1 %2457, %v739_v56   ;;  %v445_v17 = vand.u32 65535, %v415_v10  ;;  %v246_v19 = vshll.u32 %v2715_v61, %v2834_v42  ;;  %v247_v20 = vshrl.u32 %v2716_v8, %v2881_v54  ;;  %v446_v22 = vshrl.u32 %v415_v10, 16 }
  0x3e   :  { %v161_v18 = vadd.s32 536870912, %v160_v9  ;;  %v425_v25 = vmul.u32 %v423_v15, %v421_v13  ;;  %v426_v28 = vmul.u32 %v424_v16, %v421_v13  ;;  %v427_v30 = vmul.u32 %v423_v15, %v422_v14 }
  0x3f   :  { %v2924_v31 = vadd.s32 1, %v2838_v44  ;;  %v2928_v35 = vor.u32 %v244_v49, %v243_v45  ;;  %v388_v36 = vshrl.u32 %v2711_v53, %v2846_v11  ;;  %v448_v37 = vmul.u32 %v446_v22, %v421_v13 }
  0x40   :  { %v2926_v33 = vshrl.u32 %v161_v18, 30  ;;  %v428_v40 = vmul.u32 %v424_v16, %v422_v14  ;;  %v429_v41 = vshll.u32 %v426_v28, 16  ;;  %v431_v48 = vshll.u32 %v427_v30, 16 }
  0x41   :  { %v449_v50 = vmul.u32 %v445_v17, %v422_v14  ;;  %v248_v58 = vor.u32 %v247_v20, %v246_v19  ;;  %vm252_vm1 = vcmp.lt.s32.totalorder %v2891_v0, 4  ;;  %v409_v44 = vsel %vm407_vm15, %v397_v47, 2102212464 }
  0x42   :  { %v163_v52 = vshll.u32 %v2926_v33, 30  ;;  %vm433_vm2 = vc.u32 %v425_v25, %v429_v41  ;;  %v435_v56 = vadd.s32 %v429_v41, %v425_v25  ;;  %v447_v60 = vmul.u32 %v445_v17, %v421_v13 }
  0x43   :  { %v451_v62 = vshll.u32 %v448_v37, 16  ;;  %v408_v11 = vsel %vm404_vm12, %v388_v36, %v2863_v34  ;;  %v430_v45 = vshrl.u32 %v426_v28, 16  ;;  %v434_v4 = vsel %vm433_vm2, 1, %v2709_v3 }
  0x44   :  { %v164_v63 = vsub.s32 %v160_v9, %v163_v52  ;;  %v436_v51 = vadd.s32 %v434_v4, %v428_v40  ;;  %vm437_vm3 = vc.u32 %v435_v56, %v431_v48  ;;  %v450_v29 = vmul.u32 %v446_v22, %v422_v14 }
  0x45   :  { %v453_v5 = vshll.u32 %v449_v50, 16  ;;  %v410_v47 = vsel %vm406_vm14, %v2868_v39, %v409_v44  ;;  %v438_v6 = vsel %vm437_vm3, 1, %v2709_v3  ;;  %v432_v7 = vshrl.u32 %v427_v30, 16 }
  0x46   :  { %vm165_vm4 = vcmp.lt.s32.totalorder %v164_v63, 0  ;;  %v166_v49 = vsub.s32 0, %v164_v63  ;;  %v440_v9 = vadd.s32 %v438_v6, %v436_v51  ;;  %vm455_vm5 = vc.u32 %v447_v60, %v451_v62 }
  0x47   :  { %v457_v10 = vadd.s32 %v451_v62, %v447_v60  ;;  %v452_v12 = vshrl.u32 %v448_v37, 16  ;;  %v456_v13 = vsel %vm455_vm5, 1, %v2709_v3  ;;  %v217_v15 = vand.u32 2147483647, %v2785_v27 }
  0x48   :  { %v167_v34 = vsel %vm165_vm4, %v166_v49, %v164_v63  ;;  %v441_v16 = vadd.s32 %v440_v9, %v430_v45  ;;  %v458_v17 = vadd.s32 %v456_v13, %v450_v29  ;;  %v411_v18 = vsel %vm405_vm0, %v408_v11, %v410_v47 }
  0x49   :  { %v168_v14 = vclz %v167_v34  ;;  %vm459_vm6 = vc.u32 %v457_v10, %v453_v5  ;;  %vm64_vm7 = vcmp.lt.s32.totalorder %v2783_v26, 0  ;;  %v258_v20 = vsel %vm252_vm1, %v2928_v35, 920167782 }
  0x4a   :  { %v460_v39 = vsel %vm459_vm6, 1, %v2709_v3  ;;  %v454_v22 = vshrl.u32 %v449_v50, 16  ;;  %v262_v28 = vsel %vm252_vm1, %v248_v58, 1326507024  ;;  %v2955_v30 = vadd.s32 %v441_v16, %v432_v7 }
  0x4b   :  { %v2264_v19 = vadd.s32 4294967294, %v168_v14  ;;  %v462_v25 = vadd.s32 %v460_v39, %v458_v17  ;;  %v2957_v36 = vadd.s32 %v457_v10, %v453_v5  ;;  %vm538_vm8 = vcmp.gt.s32.totalorder %v2924_v31, 0 }
  0x4c   :  { %v224_v1 = vand.u32 8388607, %v217_v15  ;;  %v156_v37 = vadd.s32 %v2855_v21, %v2873_v46  ;;  %v465_v41 = vmul.u32 %v2836_v43, %v411_v18  ;;  %v234_v50 = vshll.u32 %v2711_v53, %v2834_v42 }
  0x4d   :  { %vm2265_vm9 = vcmp.lt.s32.totalorder %v2264_v19, 0  ;;  %v463_v40 = vadd.s32 %v462_v25, %v452_v12  ;;  %v235_v52 = vshrl.u32 %v2712_v55, %v2881_v54  ;;  %v237_v58 = vshll.u32 %v2712_v55, %v2834_v42 }
  0x4e   :  { %v171_v48 = vsel %vm2265_vm9, 0, %v2264_v19  ;;  %v186_v21 = vsub.s32 4, %v2926_v33  ;;  %vm467_vm10 = vc.u32 %v2955_v30, %v2957_v36  ;;  %v225_v43 = vor.u32 8388608, %v224_v1 }
  0x4f   :  { %v172_v44 = vsub.s32 32, %v171_v48  ;;  %v173_v56 = vshll.u32 %v164_v63, %v171_v48  ;;  %v176_v60 = vsub.s32 4294967266, %v171_v48  ;;  %v464_v62 = vadd.s32 %v463_v40, %v454_v22 }
  0x50   :  { %v238_v46 = vshrl.u32 %v2713_v57, %v2881_v54  ;;  %v240_v51 = vshll.u32 %v2713_v57, %v2834_v42  ;;  %v2978_v29 = vor.u32 %v235_v52, %v234_v50  ;;  %v241_v5 = vshrl.u32 %v2714_v59, %v2881_v54 }
  0x51   :  { %v174_v11 = vshrl.u32 %v156_v37, %v172_v44  ;;  %v177_v45 = vadd.s32 127, %v176_v60  ;;  %v468_v4 = vadd.s32 1, %v464_v62  ;;  %vm249_vm11 = vcmp.lt.s32.totalorder %v2891_v0, 1 }
  0x52   :  { %v2980_v63 = vor.u32 %v238_v46, %v237_v58  ;;  %vm251_vm12 = vcmp.lt.s32.totalorder %v2891_v0, 3  ;;  %v187_v7 = vsel %vm64_vm7, %v186_v21, %v2926_v33  ;;  %v242_v42 = vor.u32 %v241_v5, %v240_v51 }
  0x53   :  { %v175_v49 = vor.u32 %v174_v11, %v173_v56  ;;  %v178_v47 = vshll.u32 %v177_v45, 23  ;;  %v469_v6 = vsel %vm467_vm10, %v468_v4, %v464_v62  ;;  %vm250_vm13 = vcmp.lt.s32.totalorder %v2891_v0, 2 }
  0x54   :  { %v470_v9 = vadd.s32 %v469_v6, %v465_v41  ;;  %v263_v12 = vsel %vm251_vm12, %v2928_v35, %v262_v28  ;;  %v2993_v13 = vshll.u32 %v225_v43, 8  ;;  %v257_v16 = vsel %vm249_vm11, %v2978_v29, %v2980_v63 }
  0x55   :  { %v179_v10 = vor.u32 4788187, %v178_v47  ;;  %v182_v34 = vcvt.s32.f32 %v175_v49  ;;  %v259_v33 = vsel %vm251_vm12, %v242_v42, %v258_v20  ;;  %v261_v17 = vsel %vm249_vm11, %v2980_v63, %v242_v42 }
  0x56   :  { %v471_v14 = vadd.s32 536870912, %v470_v9  ;;  %vm3006_vm14 = vcmp.le.f32.partialorder %v62_v32, 0.7853982  ;;  %v539_v39 = vsel %vm538_vm8, %v2924_v31, 0  ;;  %v264_v19 = vsel %vm250_vm13, %v261_v17, %v263_v12 }
  0x57   :  { %v180_v35 = vand.u32 2147483647, %v179_v10  ;;  %v189_v20 = vsel %vm3006_vm14, 0, %v187_v7  ;;  %v266_v25 = vand.u32 65535, %v2993_v13  ;;  %v3021_v32 = vshrl.u32 %v2993_v13, 16 }
  0x58   :  { %v3017_v22 = vshrl.u32 %v471_v14, 30  ;;  %v3025_v1 = vsel %vm250_vm13, %v257_v16, %v259_v33  ;;  %v268_v37 = vand.u32 65535, %v264_v19  ;;  %v269_v31 = vshrl.u32 %v264_v19, 16 }
  0x59   :  { %v183_v28 = vmul.f32 %v182_v34, %v180_v35  ;;  %v3028_v41 = vshrl.u32 %v539_v39, 5  ;;  %v3030_v48 = vand.u32 31, %v539_v39  ;;  %v206_v56 = vadd.s32 3, %v189_v20 }
  0x5a   :  { %v473_v40 = vshll.u32 %v3017_v22, 30  ;;  %v270_v52 = vmul.u32 %v268_v37, %v266_v25  ;;  %v271_v58 = vmul.u32 %v269_v31, %v266_v25  ;;  %v3033_v44 = vmul.u32 %v268_v37, %v3021_v32 }
  0x5b   :  { %v184_v50 = vxor.u32 2147483648, %v183_v28  ;;  %v233_v62 = vshrl.u32 %v2711_v53, %v2881_v54  ;;  %v291_v21 = vshrl.u32 %v3025_v1, 16  ;;  %v273_v46 = vmul.u32 %v269_v31, %v3021_v32 }
  0x5c   :  { %v3035_v60 = vsub.s32 %v470_v9, %v473_v40  ;;  %v274_v11 = vshll.u32 %v271_v58, 16  ;;  %v290_v45 = vand.u32 65535, %v3025_v1  ;;  %v276_v54 = vshll.u32 %v3033_v44, 16 }
  0x5d   :  { %v185_v43 = vsel %vm64_vm7, %v184_v50, %v183_v28  ;;  %v3051_v49 = vsub.s32 32, %v3030_v48  ;;  %v3053_v6 = vand.u32 3, %v206_v56  ;;  %v3057_v10 = vmul.u32 %v291_v21, %v266_v25 }
  0x5e   :  { %v188_v4 = vsel %vm3006_vm14, %v2783_v26, %v185_v43  ;;  %vm475_vm15 = vcmp.lt.s32.totalorder %v3035_v60, 0  ;;  %v476_v51 = vsub.s32 0, %v3035_v60  ;;  %vm278_vm0 = vc.u32 %v270_v52, %v274_v11 }
  0x5f   :  { %v190_v5 = vmul.f32 %v188_v4, %v188_v4  ;;  %v280_v47 = vadd.s32 %v274_v11, %v270_v52  ;;  %v279_v9 = vsel %vm278_vm0, 1, %v2709_v3  ;;  %v254_v33 = vsel %vm252_vm1, %v242_v42, 2102212464 }
  0x60   :  { %v477_v7 = vsel %vm475_vm15, %v476_v51, %v3035_v60  ;;  %v281_v16 = vadd.s32 %v279_v9, %v273_v46  ;;  %v292_v17 = vmul.u32 %v290_v45, %v266_v25  ;;  %v296_v18 = vshll.u32 %v3057_v10, 16 }
  0x61   :  { %v191_v34 = vmul.f32 -0.001358992, %v190_v5  ;;  %v198_v12 = vmul.f32 -0.00019511016, %v190_v5  ;;  %v478_v14 = vclz %v477_v7  ;;  %vm282_vm2 = vc.u32 %v280_v47, %v276_v54 }
  0x62   :  { %v283_v20 = vsel %vm282_vm2, 1, %v2709_v3  ;;  %v466_v28 = vadd.s32 %v2957_v36, %v2955_v30  ;;  %v275_v1 = vshrl.u32 %v271_v58, 16  ;;  %v294_v31 = vmul.u32 %v290_v45, %v3021_v32 }
  0x63   :  { %v192_v35 = vadd.f32 0.041655596, %v191_v34  ;;  %v199_v39 = vadd.f32 0.008332121, %v198_v12  ;;  %v2270_v19 = vadd.s32 4294967294, %v478_v14  ;;  %v285_v37 = vadd.s32 %v283_v20, %v281_v16 }
  0x64   :  { %v253_v42 = vsel %vm249_vm11, %v233_v62, %v2978_v29  ;;  %vm209_vm1 = vcmp.eq.s32.totalorder %v3053_v6, 0  ;;  %v255_v52 = vsel %vm251_vm12, %v2980_v63, %v254_v33  ;;  %v277_v30 = vshrl.u32 %v3033_v44, 16 }
  0x65   :  { %v193_v40 = vmul.f32 %v192_v35, %v190_v5  ;;  %v200_v50 = vmul.f32 %v199_v39, %v190_v5  ;;  %vm2271_vm3 = vcmp.lt.s32.totalorder %v2270_v19, 0  ;;  %vm300_vm4 = vc.u32 %v292_v17, %v296_v18 }
  0x66   :  { %v481_v25 = vsel %vm2271_vm3, 0, %v2270_v19  ;;  %vm208_vm5 = vcmp.lt.s32.totalorder %v3053_v6, 2  ;;  %v286_v11 = vadd.s32 %v285_v37, %v275_v1  ;;  %v295_v29 = vmul.u32 %v291_v21, %v3021_v32 }
  0x67   :  { %v194_v36 = vadd.f32 -0.4999988, %v193_v40  ;;  %v201_v58 = vadd.f32 -0.16666654, %v200_v50  ;;  %v482_v56 = vsub.s32 32, %v481_v25  ;;  %v483_v43 = vshll.u32 %v3035_v60, %v481_v25 }
  0x68   :  { %v486_v46 = vsub.s32 4294967266, %v481_v25  ;;  %v298_v62 = vshll.u32 %v294_v31, 16  ;;  %v301_v63 = vsel %vm300_vm4, 1, %v2709_v3  ;;  %vm212_vm6 = vcmp.eq.s32.totalorder %v3053_v6, 2 }
  0x69   :  { %v195_v45 = vmul.f32 %v194_v36, %v190_v5  ;;  %v202_v51 = vmul.f32 %v201_v58, %v190_v5  ;;  %v484_v54 = vshrl.u32 %v466_v28, %v482_v56  ;;  %v496_v47 = vsub.s32 4, %v3017_v22 }
  0x6a   :  { %v487_v44 = vadd.s32 127, %v486_v46  ;;  %v256_v7 = vsel %vm250_vm13, %v253_v42, %v255_v52  ;;  %v302_v12 = vadd.s32 %v296_v18, %v292_v17  ;;  %v3082_v32 = vadd.s32 %v286_v11, %v277_v30 }
  0x6b   :  { %v196_v9 = vadd.f32 1.0, %v195_v45  ;;  %v203_v60 = vadd.f32 1.0, %v202_v51  ;;  %v485_v34 = vor.u32 %v484_v54, %v483_v43  ;;  %v297_v21 = vshrl.u32 %v3057_v10, 16 }
  0x6c   :  { %v488_v14 = vshll.u32 %v487_v44, 23  ;;  %v303_v5 = vadd.s32 %v301_v63, %v295_v29  ;;  %vm304_vm7 = vc.u32 %v302_v12, %v298_v62  ;;  %v527_v35 = vand.u32 2147483647, %v2778_v24 }
  0x6d   :  { %v204_v16 = vmul.f32 %v203_v60, %v188_v4  ;;  %v213_v33 = vxor.u32 2147483648, %v196_v9  ;;  %v492_v19 = vcvt.s32.f32 %v485_v34  ;;  %v305_v0 = vsel %vm304_vm7, 1, %v2709_v3 }
  0x6e   :  { %v489_v39 = vor.u32 4788187, %v488_v14  ;;  %v3087_v20 = vadd.s32 %v302_v12, %v298_v62  ;;  %v299_v18 = vshrl.u32 %v294_v31, 16  ;;  %v307_v1 = vadd.s32 %v305_v0, %v303_v5 }
  0x6f   :  { %v210_v28 = vxor.u32 2147483648, %v204_v16  ;;  %v214_v17 = vsel %vm212_vm6, %v213_v33, %v204_v16  ;;  %vm205_vm8 = vweird.f32 %v2783_v26  ;;  %vm3094_vm9 = vcmp.le.f32.partialorder %v372_v38, 0.7853982 }
  0x70   :  { %vm374_vm10 = vcmp.lt.s32.totalorder %v2776_v23, 0  ;;  %v490_v10 = vand.u32 2147483647, %v489_v39  ;;  %v308_v31 = vadd.s32 %v307_v1, %v297_v21  ;;  %v310_v50 = vmul.u32 %v2993_v13, %v256_v7 }
  0x71   :  { %v211_v37 = vsel %vm209_vm1, %v196_v9, %v210_v28  ;;  %v497_v40 = vsel %vm374_vm10, %v496_v47, %v3017_v22  ;;  %vm312_vm11 = vc.u32 %v3082_v32, %v3087_v20  ;;  %v534_v42 = vand.u32 8388607, %v527_v35 }
  0x72   :  { %v215_v26 = vsel %vm208_vm5, %v211_v37, %v214_v17  ;;  %v493_v38 = vmul.f32 %v492_v19, %v490_v10  ;;  %v309_v52 = vadd.s32 %v308_v31, %v299_v18  ;;  %v547_v30 = vshll.u32 %v2712_v55, %v3030_v48 }
  0x73   :  { %v3111_v25 = vsel %vm205_vm8, nan, %v215_v26  ;;  %v548_v22 = vshrl.u32 %v2713_v57, %v3051_v49  ;;  %v550_v36 = vshll.u32 %v2713_v57, %v3030_v48  ;;  %v551_v58 = vshrl.u32 %v2714_v59, %v3051_v49 }
  0x74   :  { %v494_v13 = vxor.u32 2147483648, %v493_v38  ;;  %v693_v6 = vrot.slane %v3111_v25, 7  ;;  %v313_v56 = vadd.s32 1, %v309_v52  ;;  %v553_v43 = vshll.u32 %v2714_v59, %v3030_v48 }
  0x75   :  { %v554_v46 = vshrl.u32 %v2715_v61, %v3051_v49  ;;  %v556_v11 = vshll.u32 %v2715_v61, %v3030_v48  ;;  %v499_v62 = vsel %vm3094_vm9, 0, %v497_v40  ;;  %v535_v57 = vor.u32 8388608, %v534_v42 }
  0x76   :  { %v495_v29 = vsel %vm374_vm10, %v494_v13, %v493_v38  ;;  %703 = vst [vmem:[#allocation2] sm:$0xfe] %v693_v6  ;;  %v557_v45 = vshrl.u32 %v2716_v8, %v3051_v49  ;;  %v314_v61 = vsel %vm312_vm11, %v313_v56, %v309_v52  ;;  %v544_v51 = vshll.u32 %v2711_v53, %v3030_v48 }
  0x77   :  { %v498_v59 = vsel %vm3094_vm9, %v2776_v23, %v495_v29  ;;  %v3144_v54 = vor.u32 %v548_v22, %v547_v30  ;;  %v315_v44 = vadd.s32 %v314_v61, %v310_v50  ;;  %v3146_v47 = vor.u32 %v551_v58, %v550_v36 }
  0x78   :  { %v500_v63 = vmul.f32 %v498_v59, %v498_v59  ;;  %v558_v7 = vor.u32 %v557_v45, %v556_v11  ;;  %v545_v8 = vshrl.u32 %v2712_v55, %v3051_v49  ;;  %v555_v9 = vor.u32 %v554_v46, %v553_v43 }
  0x79   :  { %vm559_vm12 = vcmp.lt.s32.totalorder %v3028_v41, 1  ;;  %vm562_vm13 = vcmp.lt.s32.totalorder %v3028_v41, 4  ;;  %v316_v12 = vadd.s32 536870912, %v315_v44  ;;  %vm561_vm14 = vcmp.lt.s32.totalorder %v3028_v41, 3 }
  0x7a   :  { %v501_v60 = vmul.f32 -0.001358992, %v500_v63  ;;  %v508_v34 = vmul.f32 -0.00019511016, %v500_v63  ;;  %v516_v48 = vadd.s32 3, %v499_v62  ;;  %vm560_vm15 = vcmp.lt.s32.totalorder %v3028_v41, 2 }
  0x7b   :  { %v572_v14 = vsel %vm562_vm13, %v558_v7, 1326507024  ;;  %v3156_v21 = vshll.u32 %v535_v57, 8  ;;  %v3158_v16 = vshrl.u32 %v316_v12, 30  ;;  %v571_v33 = vsel %vm559_vm12, %v3144_v54, %v3146_v47 }
  0x7c   :  { %v502_v5 = vadd.f32 0.041655596, %v501_v60  ;;  %v509_v55 = vadd.f32 0.008332121, %v508_v34  ;;  %v3164_v39 = vor.u32 %v545_v8, %v544_v51  ;;  %v573_v19 = vsel %vm561_vm14, %v555_v9, %v572_v14 }
  0x7d   :  { %v318_v17 = vshll.u32 %v3158_v16, 30  ;;  %v568_v18 = vsel %vm562_vm13, %v555_v9, 920167782  ;;  %v574_v1 = vsel %vm560_vm15, %v571_v33, %v573_v19  ;;  %v576_v4 = vand.u32 65535, %v3156_v21 }
  0x7e   :  { %v503_v0 = vmul.f32 %v502_v5, %v500_v63  ;;  %v510_v28 = vmul.f32 %v509_v55, %v500_v63  ;;  %v3175_v10 = vshrl.u32 %v3156_v21, 16  ;;  %v517_v31 = vand.u32 3, %v516_v48 }
  0x7f   :  { %v319_v50 = vsub.s32 %v315_v44, %v318_v17  ;;  %v567_v26 = vsel %vm559_vm12, %v3164_v39, %v3144_v54  ;;  %v569_v38 = vsel %vm561_vm14, %v3146_v47, %v568_v18  ;;  %v578_v42 = vand.u32 65535, %v574_v1 }
  0x80   :  { %v504_v37 = vadd.f32 -0.4999988, %v503_v0  ;;  %v511_v40 = vadd.f32 -0.16666654, %v510_v28  ;;  %v579_v52 = vshrl.u32 %v574_v1, 16  ;;  %vm515_vm2 = vweird.f32 %v2776_v23 }
  0x81   :  { %vm320_vm0 = vcmp.lt.s32.totalorder %v319_v50, 0  ;;  %v321_v13 = vsub.s32 0, %v319_v50  ;;  %v580_v36 = vmul.u32 %v578_v42, %v576_v4  ;;  %v3185_v56 = vmul.u32 %v578_v42, %v3175_v10 }
  0x82   :  { %v505_v30 = vmul.f32 %v504_v37, %v500_v63  ;;  %v512_v22 = vmul.f32 %v511_v40, %v500_v63  ;;  %v581_v58 = vmul.u32 %v579_v52, %v576_v4  ;;  %vm522_vm3 = vcmp.eq.s32.totalorder %v517_v31, 2 }
  0x83   :  { %v322_v11 = vsel %vm320_vm0, %v321_v13, %v319_v50  ;;  %v570_v62 = vsel %vm560_vm15, %v567_v26, %v569_v38  ;;  %v583_v51 = vmul.u32 %v579_v52, %v3175_v10  ;;  %v586_v63 = vshll.u32 %v3185_v56, 16 }
  0x84   :  { %v506_v43 = vadd.f32 1.0, %v505_v30  ;;  %v513_v46 = vadd.f32 1.0, %v512_v22  ;;  %v323_v29 = vclz %v322_v11  ;;  %v584_v57 = vshll.u32 %v581_v58, 16 }
  0x85   :  { %vm519_vm1 = vcmp.eq.s32.totalorder %v517_v31, 0  ;;  %vm518_vm5 = vcmp.lt.s32.totalorder %v517_v31, 2  ;;  %v311_v60 = vadd.s32 %v3087_v20, %v3082_v32  ;;  %v600_v12 = vand.u32 65535, %v570_v62 }
  0x86   :  { %v514_v45 = vmul.f32 %v513_v46, %v498_v59  ;;  %v523_v61 = vxor.u32 2147483648, %v506_v43  ;;  %v2267_v44 = vadd.s32 4294967294, %v323_v29  ;;  %vm588_vm4 = vc.u32 %v580_v36, %v584_v57 }
  0x87   :  { %v590_v7 = vadd.s32 %v584_v57, %v580_v36  ;;  %v589_v34 = vsel %vm588_vm4, 1, %v2709_v3  ;;  %v601_v59 = vshrl.u32 %v570_v62, 16  ;;  %vm692_vm8 = vcmask 1040384  }
  0x88   :  { %v520_v8 = vxor.u32 2147483648, %v514_v45  ;;  %v524_v9 = vsel %vm522_vm3, %v523_v61, %v514_v45  ;;  %vm2268_vm6 = vcmp.lt.s32.totalorder %v2267_v44, 0  ;;  %v591_v5 = vadd.s32 %v589_v34, %v583_v51 }
  0x89   :  { %v326_v14 = vsel %vm2268_vm6, 0, %v2267_v44  ;;  %vm592_vm7 = vc.u32 %v590_v7, %v586_v63  ;;  %v585_v1 = vshrl.u32 %v581_v58, 16  ;;  %v602_v37 = vmul.u32 %v600_v12, %v576_v4 }
  0x8a   :  { %v521_v48 = vsel %vm519_vm1, %v506_v43, %v520_v8  ;;  %v327_v33 = vsub.s32 32, %v326_v14  ;;  %v328_v19 = vshll.u32 %v319_v50, %v326_v14  ;;  %v331_v0 = vsub.s32 4294967266, %v326_v14 }
  0x8b   :  { %v525_v55 = vsel %vm518_vm5, %v521_v48, %v524_v9  ;;  %v593_v20 = vsel %vm592_vm7, 1, %v2709_v3  ;;  %v603_v40 = vmul.u32 %v601_v59, %v576_v4  ;;  %v604_v31 = vmul.u32 %v600_v12, %v3175_v10 }
  0x8c   :  { %v526_v28 = vsel %vm515_vm2, nan, %v525_v55  ;;  %v329_v18 = vshrl.u32 %v311_v60, %v327_v33  ;;  %v332_v32 = vadd.s32 127, %v331_v0  ;;  %v595_v42 = vadd.s32 %v593_v20, %v591_v5 }
  0x8d   :  { %v695_v17 = vrot.slane %v526_v28, 7  ;;  %v605_v23 = vmul.u32 %v601_v59, %v3175_v10  ;;  %v606_v52 = vshll.u32 %v603_v40, 16  ;;  %v608_v30 = vshll.u32 %v604_v31, 16 }
  0x8e   :  { %v330_v50 = vor.u32 %v329_v18, %v328_v19  ;;  %v333_v38 = vshll.u32 %v332_v32, 23  ;;  %v543_v36 = vshrl.u32 %v2711_v53, %v3051_v49  ;;  %v564_v4 = vsel %vm562_vm13, %v3146_v47, 2102212464 }
  0x8f   :  { %v696_v26 = vsel %vm692_vm8, %v693_v6, %v695_v17  ;;  %vm610_vm9 = vc.u32 %v602_v37, %v606_v52  ;;  %v612_v25 = vadd.s32 %v606_v52, %v602_v37  ;;  %v587_v58 = vshrl.u32 %v3185_v56, 16 }
  0x90   :  { %705 = vst [vmem:[#allocation2 + $0x10] sm:$0x7] %v696_v26  ;;  %v334_v22 = vor.u32 4788187, %v333_v38  ;;  %v337_v13 = vcvt.s32.f32 %v330_v50  ;;  %v596_v43 = vadd.s32 %v595_v42, %v585_v1  ;;  %v611_v46 = vsel %vm610_vm9, 1, %v2709_v3 }
  0x91   :  { %v607_v10 = vshrl.u32 %v603_v40, 16  ;;  %v613_v11 = vadd.s32 %v611_v46, %v605_v23  ;;  %vm614_vm10 = vc.u32 %v612_v25, %v608_v30  ;;  %v563_v53 = vsel %vm559_vm12, %v543_v36, %v3164_v39 }
  0x92   :  { %v335_v6 = vand.u32 2147483647, %v334_v22  ;;  %v565_v49 = vsel %vm561_vm14, %v3144_v54, %v564_v4  ;;  %v615_v47 = vsel %vm614_vm10, 1, %v2709_v3  ;;  %vm219_vm11 = vcmp.lt.s32.totalorder %v2785_v27, 0 }
  0x93   :  { %v609_v56 = vshrl.u32 %v604_v31, 16  ;;  %v617_v62 = vadd.s32 %v615_v47, %v613_v11  ;;  %vm3220_vm13 = vcmp.le.f32.partialorder %v217_v15, 0.7853982  ;;  %v597_v51 = vadd.s32 %v596_v43, %v587_v58 }
  0x94   :  { %v338_v29 = vmul.f32 %v337_v13, %v335_v6  ;;  %v616_v39 = vadd.s32 %v612_v25, %v608_v30  ;;  %v341_v63 = vsub.s32 4, %v3158_v16  ;;  %v566_v3 = vsel %vm560_vm15, %v563_v53, %v565_v49 }
  0x95   :  { %v618_v54 = vadd.s32 %v617_v62, %v607_v10  ;;  %v620_v9 = vmul.u32 %v3156_v21, %v566_v3  ;;  %vm360_vm3 = vweird.f32 %v2785_v27  ;;  %v759_v62 = vld [vmem:[%s4202_s2 + $0xb0] sm:$0xff]  ;;  %vm3251_vm4 = vcmp.lt.s32.totalorder %v32_v2, 256 }
  0x96   :  { %v339_v61 = vxor.u32 2147483648, %v338_v29  ;;  %vm622_vm12 = vc.u32 %v597_v51, %v616_v39  ;;  %v342_v60 = vsel %vm219_vm11, %v341_v63, %v3158_v16  ;;  %v621_v4 = vadd.s32 %v616_v39, %v597_v51  ;;  %873 = vperm.xlu0 %2456, %v759_v62   ;;  %v1309_v62 = vld [vmem:[%s4204_s4] sm:$0xff]  ;;  %v2352_v39 = vld [vmem:[%s4204_s4 + $0x68] sm:$0xff] }
  0x97   :  { %v735_v57 = vld [vmem:[#allocation2 + $0x10] sm:$0xff]  ;;  %v619_v7 = vadd.s32 %v618_v54, %v609_v56  ;;  %v344_v48 = vsel %vm3220_vm13, 0, %v342_v60  ;;  %v4219_v45 = vmov 0  ;;  %vm529_vm5 = vcmp.lt.s32.totalorder %v2778_v24, 0  ;;  %v709_v60 = vld [vmem:[%s4201_s1] sm:$0xff] }
  0x98   :  { %968 = vmatpush.msra.mxu0 %v735_v57  ;;  %2435 = vmatpush.msra.mxu2 %v735_v57  ;;  %v340_v44 = vsel %vm219_vm11, %v339_v61, %v338_v29  ;;  %v361_v28 = vadd.s32 3, %v344_v48  ;;  %v29_v57 = vld [vmem:[%s4200_s0] ss:$2 sm:$0x3]  ;;  %v4220_v45 = vsel %vm3251_vm4, 4294967295, %v4219_v45  ;;  %vm881_vm7 = vcmask 130048  }
  0x99   :  { %v343_v15 = vsel %vm3220_vm13, %v2785_v27, %v340_v44  ;;  %v623_v41 = vadd.s32 1, %v619_v7  ;;  %4221 = vst [vmem:[#allocation8_spill] sm:$0xff] %v4220_v45  ;;  %vm3260_vm6 = vcmp.le.f32.partialorder %v527_v35, 0.7853982  ;;  %vm670_vm13 = vweird.f32 %v2778_v24 }
  0x9a   :  { %v345_v8 = vmul.f32 %v343_v15, %v343_v15  ;;  %v362_v1 = vand.u32 3, %v361_v28  ;;  %686 = vst.msk [vmem:[#allocation2] ss:$8 sm:$0x3] %vm3251_vm4, %v29_v57  ;;  %v718_v57 = vld [vmem:[%s4201_s1 + $0x48] sm:$0xff] }
  0x9b   :  { %v624_v59 = vsel %vm622_vm12, %v623_v41, %v619_v7  ;;  %v738_v41 = vld [vmem:[%s4202_s2 + $0x8] sm:$0xff]  ;;  %vm1357_vm12 = vcmask 523264  }
  0x9c   :  { %v346_v34 = vmul.f32 -0.001358992, %v345_v8  ;;  %v353_v12 = vmul.f32 -0.00019511016, %v345_v8  ;;  %v625_v55 = vadd.s32 %v624_v59, %v620_v9  ;;  %vm364_vm15 = vcmp.eq.s32.totalorder %v362_v1, 0  ;;  %768 = vperm.xlu1 %2457, %v738_v41   ;;  %v745_v41 = vld [vmem:[%s4202_s2 + $0x40] sm:$0xff] }
  0x9d   :  { %vm367_vm0 = vcmp.eq.s32.totalorder %v362_v1, 2  ;;  %vm363_vm2 = vcmp.lt.s32.totalorder %v362_v1, 2 }
  0x9e   :  { %v347_v14 = vadd.f32 0.041655596, %v346_v34  ;;  %v354_v5 = vadd.f32 0.008332121, %v353_v12  ;;  %v626_v0 = vadd.s32 536870912, %v625_v55 }
  0xa0   :  { %v348_v33 = vmul.f32 %v347_v14, %v345_v8  ;;  %v355_v19 = vmul.f32 %v354_v5, %v345_v8  ;;  %v627_v18 = vshrl.u32 %v626_v0, 30  ;;  %v752_v0 = vld [vmem:[%s4202_s2 + $0x78] sm:$0xff] }
  0xa1   :  { %v733_v7 = vld [vmem:[#allocation2] sm:$0xff] }
  0xa2   :  { %v349_v21 = vadd.f32 -0.4999988, %v348_v33  ;;  %v356_v17 = vadd.f32 -0.16666654, %v355_v19  ;;  %v628_v16 = vshll.u32 %v627_v18, 30  ;;  %v651_v51 = vsub.s32 4, %v627_v18  ;;  %969 = vmatpush.msra.mxu0 %v733_v7  ;;  %2436 = vmatpush.msra.mxu2 %v733_v7 }
  0xa3   :  { %2275 = vmatmul.msk.f32.vlgmr.msra.gmra.mxu0 %vm881_vm7, %v709_v60  ;;  %v710_v33 = vld [vmem:[%s4201_s1 + $0x8] sm:$0xff] }
  0xa4   :  { %v350_v32 = vmul.f32 %v349_v21, %v345_v8  ;;  %v357_v20 = vmul.f32 %v356_v17, %v345_v8  ;;  %v629_v31 = vsub.s32 %v625_v55, %v628_v16  ;;  %v652_v2 = vsel %vm529_vm5, %v651_v51, %v627_v18  ;;  %v754_v8 = vld [vmem:[%s4202_s2 + $0x88] sm:$0xff]  ;;  %v737_v17 = vld [vmem:[%s4202_s2] sm:$0xff]  ;;  %v2353_v51 = vld [vmem:[%s4204_s4 + $0x70] sm:$0xff] }
  0xa5   :  { %848 = vperm.xlu0 %2456, %v754_v8   ;;  %763 = vperm.xlu1 %2457, %v737_v17   ;;  %v746_v7 = vld [vmem:[%s4202_s2 + $0x48] sm:$0xff]  ;;  %v2347_v8 = vld [vmem:[%s4204_s4 + $0x40] sm:$0xff]  ;;  %v724_v17 = vld [vmem:[%s4201_s1 + $0x78] sm:$0xff] }
  0xa6   :  { %v351_v37 = vadd.f32 1.0, %v350_v32  ;;  %v358_v40 = vadd.f32 1.0, %v357_v20  ;;  %vm630_vm14 = vcmp.lt.s32.totalorder %v629_v31, 0  ;;  %v631_v38 = vsub.s32 0, %v629_v31 }
  0xa8   :  { %v359_v26 = vmul.f32 %v358_v40, %v343_v15  ;;  %v368_v50 = vxor.u32 2147483648, %v351_v37  ;;  %v632_v23 = vsel %vm630_vm14, %v631_v38, %v629_v31  ;;  %v654_v15 = vsel %vm3260_vm6, 0, %v652_v2  ;;  %v711_v40 = vld [vmem:[%s4201_s1 + $0x10] sm:$0xff]  ;;  %v2350_v2 = vld [vmem:[%s4204_s4 + $0x58] sm:$0xff] }
  0xa9   :  { %v633_v52 = vclz %v632_v23  ;;  %v671_v59 = vadd.s32 3, %v654_v15  ;;  %v3402_v15 = vld [vmem:[%s4201_s1 + $0xa0] sm:$0xff] }
  0xaa   :  { %v365_v42 = vxor.u32 2147483648, %v359_v26  ;;  %v369_v22 = vsel %vm367_vm0, %v368_v50, %v359_v26 }
  0xab   :  { %v2273_v13 = vadd.s32 4294967294, %v633_v52  ;;  %v672_v19 = vand.u32 3, %v671_v59  ;;  %2276 = vmatmul.msk.f32.gmra.mxu0 %vm881_vm7, %v710_v33  ;;  %v756_v52 = vld [vmem:[%s4202_s2 + $0x98] sm:$0xff]  ;;  %v722_v59 = vld [vmem:[%s4201_s1 + $0x68] sm:$0xff] }
  0xac   :  { %v366_v30 = vsel %vm364_vm15, %v351_v37, %v365_v42  ;;  %858 = vperm.xlu2 %2458, %v756_v52   ;;  %v2379_v52 = vld [vmem:[%s4204_s4 + $0x80] sm:$0xff] }
  0xad   :  { %v370_v36 = vsel %vm363_vm2, %v366_v30, %v369_v22  ;;  %vm2274_vm1 = vcmp.lt.s32.totalorder %v2273_v13, 0  ;;  %838 = vperm.xlu0 %2456, %v752_v0   ;;  %vm677_vm9 = vcmp.eq.s32.totalorder %v672_v19, 2  ;;  %vm674_vm10 = vcmp.eq.s32.totalorder %v672_v19, 0  ;;  %v1315_v30 = vld [vmem:[%s4204_s4 + $0x30] sm:$0xff]  ;;  %1319 = vperm.xlu1 %2457, %v1309_v62   ;;  %v2351_v0 = vld [vmem:[%s4204_s4 + $0x60] sm:$0xff] }
  0xae   :  { %v636_v25 = vsel %vm2274_vm1, 0, %v2273_v13  ;;  %v3239_v46 = vsel %vm360_vm3, nan, %v370_v36  ;;  %vm673_vm11 = vcmp.lt.s32.totalorder %v672_v19, 2  ;;  %v713_v36 = vld [vmem:[%s4201_s1 + $0x20] sm:$0xff]  ;;  %v732_v19 = vld [vmem:[%s4201_s1 + $0xb8] sm:$0xff] }
  0xaf   :  { %v637_v6 = vsub.s32 32, %v636_v25  ;;  %v638_v58 = vshll.u32 %v629_v31, %v636_v25  ;;  %v641_v43 = vsub.s32 4294967266, %v636_v25  ;;  %v694_v49 = vrot.slane %v3239_v46, 7  ;;  %v1316_v31 = vld [vmem:[%s4204_s4 + $0x38] sm:$0xff]  ;;  %v1314_v25 = vld [vmem:[%s4204_s4 + $0x28] sm:$0xff]  ;;  %v715_v46 = vld [vmem:[%s4201_s1 + $0x30] sm:$0xff] }
  0xb1   :  { %v639_v10 = vshrl.u32 %v621_v4, %v637_v6  ;;  %v642_v11 = vadd.s32 127, %v641_v43  ;;  %704 = vst [vmem:[#allocation2 + $0x8] sm:$0xfe] %v694_v49  ;;  %v755_v4 = vld [vmem:[%s4202_s2 + $0x90] sm:$0xff]  ;;  %v714_v6 = vld [vmem:[%s4201_s1 + $0x28] sm:$0xff]  ;;  %v1313_v43 = vld [vmem:[%s4204_s4 + $0x20] sm:$0xff] }
  0xb3   :  { %v640_v29 = vor.u32 %v639_v10, %v638_v58  ;;  %v643_v53 = vshll.u32 %v642_v11, 23  ;;  %2277 = vmatmul.msk.f32.gmra.mxu0 %vm881_vm7, %v711_v40  ;;  %v744_v58 = vld [vmem:[%s4202_s2 + $0x38] sm:$0xff]  ;;  %v751_v10 = vld [vmem:[%s4202_s2 + $0x70] sm:$0xff] }
  0xb4   :  { %853 = vperm.xlu2 %2458, %v755_v4   ;;  %v1312_v11 = vld [vmem:[%s4204_s4 + $0x18] sm:$0xff]  ;;  %v2413_v4 = vld [vmem:[%s4204_s4 + $0xd0] sm:$0xff] }
  0xb5   :  { %v644_v47 = vor.u32 4788187, %v643_v53  ;;  %v647_v56 = vcvt.s32.f32 %v640_v29  ;;  %1354 = vperm.xlu0 %2456, %v1316_v31   ;;  %v716_v29 = vld [vmem:[%s4201_s1 + $0x38] sm:$0xff]  ;;  %v750_v53 = vld [vmem:[%s4202_s2 + $0x68] sm:$0xff]  ;;  %1557 = vperm.xlu1 %2457, %v2352_v39  }
  0xb6   :  { %v2418_v31 = vld [vmem:[%s4204_s4 + $0xf8] sm:$0xff] }
  0xb7   :  { %v645_v27 = vand.u32 2147483647, %v644_v47  ;;  %v717_v47 = vld [vmem:[%s4201_s1 + $0x40] sm:$0xff] }
  0xb8   :  { %v734_v13 = vld [vmem:[#allocation2 + $0x8] sm:$0xff] }
  0xb9   :  { %v648_v61 = vmul.f32 %v647_v56, %v645_v27  ;;  %v749_v56 = vld [vmem:[%s4202_s2 + $0x60] sm:$0xff]  ;;  %v1310_v27 = vld [vmem:[%s4204_s4 + $0x8] sm:$0xff] }
  0xbb   :  { %v649_v63 = vxor.u32 2147483648, %v648_v61 }
  0xbc   :  { %798 = vperm.xlu2 %2458, %v744_v58   ;;  %v1236_v58 = vld [vmem:[#allocation4] sm:$0x1] }
  0xbd   :  { %v650_v3 = vsel %vm529_vm5, %v649_v63, %v648_v61  ;;  %1349 = vperm.xlu0 %2456, %v1315_v30   ;;  %v748_v61 = vld [vmem:[%s4202_s2 + $0x58] sm:$0xff]  ;;  %v719_v63 = vld [vmem:[%s4201_s1 + $0x50] sm:$0xff]  ;;  %v1232_v30 = vld [vmem:[%s4205_s5 + $0x20] sm:$0xff] }
  0xbe   :  { %v653_v54 = vsel %vm3260_vm6, %v2778_v24, %v650_v3  ;;  %v712_v24 = vld [vmem:[%s4201_s1 + $0x18] sm:$0xff]  ;;  %v747_v3 = vld [vmem:[%s4202_s2 + $0x50] sm:$0xff] }
  0xbf   :  { %v655_v44 = vmul.f32 %v653_v54, %v653_v54  ;;  %2278 = vmatmul.msk.f32.gmra.mxu0 %vm881_vm7, %v712_v24 }
  0xc1   :  { %v656_v35 = vmul.f32 -0.001358992, %v655_v44  ;;  %v663_v9 = vmul.f32 -0.00019511016, %v655_v44 }
  0xc3   :  { %v657_v34 = vadd.f32 0.041655596, %v656_v35  ;;  %v664_v12 = vadd.f32 0.008332121, %v663_v9  ;;  %v2386_v35 = vld [vmem:[%s4204_s4 + $0xb8] sm:$0xff]  ;;  %v721_v9 = vld [vmem:[%s4201_s1 + $0x60] sm:$0xff] }
  0xc4   :  { %833 = vperm.xlu2 %2458, %v751_v10   ;;  %v2416_v10 = vld [vmem:[%s4204_s4 + $0xe8] sm:$0xff] }
  0xc5   :  { %v658_v48 = vmul.f32 %v657_v34, %v655_v44  ;;  %v665_v14 = vmul.f32 %v664_v12, %v655_v44  ;;  %1344 = vperm.xlu0 %2456, %v1314_v25   ;;  %v2384_v34 = vld [vmem:[%s4204_s4 + $0xa8] sm:$0xff]  ;;  %v2383_v12 = vld [vmem:[%s4204_s4 + $0xa0] sm:$0xff]  ;;  %v1235_v25 = vld [vmem:[%s4205_s5 + $0x38] sm:$0xff] }
  0xc7   :  { %v659_v5 = vadd.f32 -0.4999988, %v658_v48  ;;  %v666_v55 = vadd.f32 -0.16666654, %v665_v14  ;;  %2279 = vmatmul.msk.f32.gmra.mxu0 %vm881_vm7, %v713_v36  ;;  %v731_v48 = vld [vmem:[%s4201_s1 + $0xb0] sm:$0xff]  ;;  %v2354_v14 = vld [vmem:[%s4204_s4 + $0x78] sm:$0xff] }
  0xc9   :  { %v660_v28 = vmul.f32 %v659_v5, %v655_v44  ;;  %v667_v21 = vmul.f32 %v666_v55, %v655_v44  ;;  %v720_v44 = vld [vmem:[%s4201_s1 + $0x58] sm:$0xff]  ;;  %v2381_v5 = vld [vmem:[%s4204_s4 + $0x90] sm:$0xff]  ;;  %v2380_v55 = vld [vmem:[%s4204_s4 + $0x88] sm:$0xff] }
  0xcb   :  { %v661_v18 = vadd.f32 1.0, %v660_v28  ;;  %v668_v32 = vadd.f32 1.0, %v667_v21  ;;  %v2411_v28 = vld [vmem:[%s4204_s4 + $0xc0] sm:$0xff]  ;;  %v2412_v21 = vld [vmem:[%s4204_s4 + $0xc8] sm:$0xff] }
  0xcc   :  { %828 = vperm.xlu2 %2458, %v750_v53   ;;  %v1228_v53 = vld [vmem:[%s4205_s5] sm:$0xff] }
  0xcd   :  { %v669_v20 = vmul.f32 %v668_v32, %v653_v54  ;;  %v678_v16 = vxor.u32 2147483648, %v661_v18  ;;  %1339 = vperm.xlu0 %2456, %v1313_v43   ;;  %v2349_v54 = vld [vmem:[%s4204_s4 + $0x50] sm:$0xff]  ;;  %v2414_v32 = vld [vmem:[%s4204_s4 + $0xd8] sm:$0xff] }
  0xce   :  { %1542 = vperm.xlu1 %2457, %v2349_v54  }
  0xcf   :  { %v675_v1 = vxor.u32 2147483648, %v669_v20  ;;  %v679_v37 = vsel %vm677_vm9, %v678_v16, %v669_v20  ;;  %2280 = vmatmul.msk.f32.gmra.mxu0 %vm881_vm7, %v714_v6  ;;  %v2415_v20 = vld [vmem:[%s4204_s4 + $0xe0] sm:$0xff] }
  0xd1   :  { %v676_v26 = vsel %vm674_vm10, %v661_v18, %v675_v1  ;;  %v2348_v18 = vld [vmem:[%s4204_s4 + $0x48] sm:$0xff]  ;;  %v2385_v1 = vld [vmem:[%s4204_s4 + $0xb0] sm:$0xff] }
  0xd2   :  { %v680_v50 = vsel %vm673_vm11, %v676_v26, %v679_v37  ;;  %v2417_v37 = vld [vmem:[%s4204_s4 + $0xf0] sm:$0xff] }
  0xd3   :  { %v681_v38 = vsel %vm670_vm13, nan, %v680_v50  ;;  %v2382_v50 = vld [vmem:[%s4204_s4 + $0x98] sm:$0xff] }
  0xd4   :  { %v697_v42 = vrot.slane %v681_v38, 7  ;;  %823 = vperm.xlu2 %2458, %v749_v56   ;;  %v1229_v38 = vld [vmem:[%s4205_s5 + $0x8] sm:$0xff]  ;;  %v1231_v56 = vld [vmem:[%s4205_s5 + $0x18] sm:$0xff] }
  0xd5   :  { %1334 = vperm.xlu0 %2456, %v1312_v11  }
  0xd6   :  { %v698_v23 = vsel %vm692_vm8, %v694_v49, %v697_v42  ;;  %v1311_v49 = vld [vmem:[%s4204_s4 + $0x10] sm:$0xff]  ;;  %1779 = vperm.xlu1 %2457, %v2386_v35   ;;  %v726_v42 = vld [vmem:[%s4201_s1 + $0x88] sm:$0xff] }
  0xd7   :  { %706 = vst [vmem:[#allocation2 + $0x18] sm:$0x7] %v698_v23  ;;  %2281 = vmatmul.msk.f32.gmra.mxu0 %vm881_vm7, %v715_v46  ;;  %v1230_v23 = vld [vmem:[%s4205_s5 + $0x10] sm:$0xff] }
  0xdc   :  { %818 = vperm.xlu2 %2458, %v748_v61  }
  0xdd   :  { %1329 = vperm.xlu0 %2456, %v1311_v49  }
  0xde   :  { %v736_v22 = vld [vmem:[#allocation2 + $0x18] sm:$0xff]  ;;  %1764 = vperm.xlu1 %2457, %v2383_v12  }
  0xdf   :  { %1057 = vmatpush.msra.mxu1 %v736_v22  ;;  %2437 = vmatpush.msra.mxu3 %v736_v22  ;;  %v727_v22 = vld [vmem:[%s4201_s1 + $0x90] sm:$0xff] }
  0xe0   :  { %2282 = vmatmul.msk.f32.gmra.mxu0 %vm881_vm7, %v716_v29 }
  0xe1   :  { %1058 = vmatpush.msra.mxu1 %v734_v13  ;;  %2438 = vmatpush.msra.mxu3 %v734_v13  ;;  %v1233_v13 = vld [vmem:[%s4205_s5 + $0x28] sm:$0xff] }
  0xe2   :  { %2299 = vmatmul.msk.f32.vlgmr.msra.gmra.mxu1 %vm881_vm7, %v709_v60  ;;  %2319 = vmatmul.msk.f32.vlgmr.msra.gmra.mxu3 %vm881_vm7, %v3402_v15  ;;  %v730_v60 = vld [vmem:[%s4201_s1 + $0xa8] sm:$0xff] }
  0xe3   :  { %2296 = vmatmul.msk.f32.vlgmr.msra.gmra.mxu2 %vm881_vm7, %v730_v60 }
  0xe4   :  { %813 = vperm.xlu2 %2458, %v747_v3  }
  0xe5   :  { %1324 = vperm.xlu0 %2456, %v1310_v27  }
  0xe6   :  { %1749 = vperm.xlu1 %2457, %v2380_v55  }
  0xe8   :  { %2283 = vmatmul.msk.f32.gmra.mxu0 %vm881_vm7, %v717_v47 }
  0xea   :  { %2300 = vmatmul.msk.f32.gmra.mxu1 %vm881_vm7, %v710_v33  ;;  %2320 = vmatmul.msk.f32.gmra.mxu3 %vm881_vm7, %v730_v60  ;;  %v723_v33 = vld [vmem:[%s4201_s1 + $0x70] sm:$0xff] }
  0xeb   :  { %2297 = vmatmul.msk.f32.gmra.mxu2 %vm881_vm7, %v731_v48 }
  0xec   :  { %808 = vperm.xlu2 %2458, %v746_v7  }
  0xed   :  { %1562 = vperm.xlu0 %2456, %v2353_v51  }
  0xee   :  { %1961 = vperm.xlu1 %2457, %v2412_v21  }
  0xf0   :  { %2284 = vmatmul.msk.f32.gmra.mxu0 %vm881_vm7, %v718_v57 }
  0xf2   :  { %2301 = vmatmul.msk.f32.gmra.mxu1 %vm881_vm7, %v711_v40  ;;  %2321 = vmatmul.msk.f32.gmra.mxu3 %vm881_vm7, %v731_v48  ;;  %v725_v40 = vld [vmem:[%s4201_s1 + $0x80] sm:$0xff] }
  0xf3   :  { %2298 = vmatmul.msk.f32.gmra.mxu2 %vm881_vm7, %v732_v19 }
  0xf4   :  { %803 = vperm.xlu2 %2458, %v745_v41   ;;  %v869_v41 = vpop.permute.xlu1 %868 }
  0xf5   :  { %1547 = vperm.xlu0 %2456, %v2350_v2  }
  0xf6   :  { %1976 = vperm.xlu1 %2457, %v2415_v20  }
  0xf8   :  { %2285 = vmatmul.msk.f32.gmra.mxu0 %vm881_vm7, %v719_v63 }
  0xfa   :  { %2302 = vmatmul.msk.f32.gmra.mxu1 %vm881_vm7, %v712_v24  ;;  %2322 = vmatmul.msk.f32.gmra.mxu3 %vm881_vm7, %v732_v19 }
  0xfc   :  { %1567 = vperm.xlu2 %2458, %v2354_v14   ;;  %v864_v55 = vpop.permute.xlu1 %863 }
  0xfd   :  { %1532 = vperm.xlu0 %2456, %v2347_v8  }
  0xfe   :  { %1991 = vperm.xlu1 %2457, %v2418_v31  }
 0x100   :  { %2286 = vmatmul.msk.f32.gmra.mxu0 %vm881_vm7, %v720_v44 }
 0x102   :  { %2303 = vmatmul.msk.f32.gmra.mxu1 %vm881_vm7, %v713_v36 }
 0x104   :  { %1552 = vperm.xlu2 %2458, %v2351_v0  }
 0x105   :  { %1769 = vperm.xlu0 %2456, %v2384_v34   ;;  %v879_v34 = vpop.permute.xlu0 %878 }
 0x106   :  { %2160 = vperm.xlu1 %2457, %v1230_v23  }
 0x108   :  { %2287 = vmatmul.msk.f32.gmra.mxu0 %vm881_vm7, %v721_v9 }
 0x10a   :  { %2304 = vmatmul.msk.f32.gmra.mxu1 %vm881_vm7, %v714_v6  ;;  %v728_v6 = vld [vmem:[%s4201_s1 + $0x98] sm:$0xff] }
 0x10c   :  { %1537 = vperm.xlu2 %2458, %v2348_v18  }
 0x10d   :  { %1754 = vperm.xlu0 %2456, %v2381_v5   ;;  %v874_v19 = vpop.permute.xlu0 %873 }
 0x10e   :  { %2175 = vperm.xlu1 %2457, %v1233_v13  }
 0x110   :  { %2288 = vmatmul.msk.f32.gmra.mxu0 %vm881_vm7, %v722_v59 }
 0x112   :  { %2305 = vmatmul.msk.f32.gmra.mxu1 %vm881_vm7, %v715_v46 }
 0x114   :  { %1774 = vperm.xlu2 %2458, %v2385_v1  }
 0x115   :  { %1956 = vperm.xlu0 %2456, %v2411_v28  }
 0x116   :  { %2232 = vperm.xlu1 %2457, %v1236_v58  }
 0x118   :  { %2289 = vmatmul.msk.f32.gmra.mxu0 %vm881_vm7, %v723_v33 }
 0x11a   :  { %2306 = vmatmul.msk.f32.gmra.mxu1 %vm881_vm7, %v716_v29 }
 0x11c   :  { %1759 = vperm.xlu2 %2458, %v2382_v50  }
 0x11d   :  { %1971 = vperm.xlu0 %2456, %v2414_v32  }
 0x120   :  { %2290 = vmatmul.msk.f32.gmra.mxu0 %vm881_vm7, %v724_v17  ;;  %v3488_v16 = vpop.f32.mrf.mxu0 }
 0x122   :  { %2307 = vmatmul.msk.f32.gmra.mxu1 %vm881_vm7, %v717_v47 }
 0x124   :  { %1744 = vperm.xlu2 %2458, %v2379_v52  }
 0x125   :  { %1986 = vperm.xlu0 %2456, %v2417_v37  }
 0x128   :  { %2291 = vmatmul.msk.f32.gmra.mxu0 %vm881_vm7, %v725_v40  ;;  %v3504_v26 = vpop.f32.mrf.mxu0 }
 0x12a   :  { %2308 = vmatmul.msk.f32.gmra.mxu1 %vm881_vm7, %v718_v57  ;;  %v1234_v57 = vld [vmem:[%s4205_s5 + $0x30] sm:$0xff] }
 0x12c   :  { %1966 = vperm.xlu2 %2458, %v2413_v4  }
 0x12d   :  { %2155 = vperm.xlu0 %2456, %v1229_v38  }
 0x130   :  { %2292 = vmatmul.msk.f32.gmra.mxu0 %vm881_vm7, %v726_v42  ;;  %v3520_v24 = vpop.f32.mrf.mxu0 }
 0x132   :  { %2309 = vmatmul.msk.f32.gmra.mxu1 %vm881_vm7, %v719_v63 }
 0x134   :  { %1981 = vperm.xlu2 %2458, %v2416_v10  }
 0x135   :  { %2170 = vperm.xlu0 %2456, %v1232_v30  }
 0x138   :  { %2293 = vmatmul.msk.f32.gmra.mxu0 %vm881_vm7, %v727_v22 }
 0x13a   :  { %2310 = vmatmul.msk.f32.gmra.mxu1 %vm881_vm7, %v720_v44 }
 0x13c   :  { %v3536_v36 = vpop.f32.mrf.mxu0  ;;  %2150 = vperm.xlu2 %2458, %v1228_v53  }
 0x13d   :  { %2185 = vperm.xlu0 %2456, %v1235_v25  }
 0x140   :  { %2294 = vmatmul.msk.f32.gmra.mxu0 %vm881_vm7, %v728_v6 }
 0x142   :  { %2311 = vmatmul.msk.f32.gmra.mxu1 %vm881_vm7, %v721_v9 }
 0x144   :  { %v3551_v46 = vpop.f32.mrf.mxu0  ;;  %2165 = vperm.xlu2 %2458, %v1231_v56   ;;  %v859_v56 = vpop.permute.xlu2 %858 }
 0x148   :  { %2295 = vmatmul.msk.f32.gmra.mxu0 %vm881_vm7, %v3402_v15 }
 0x14a   :  { %2312 = vmatmul.msk.f32.gmra.mxu1 %vm881_vm7, %v722_v59 }
 0x14c   :  { %v3561_v29 = vpop.f32.mrf.mxu0  ;;  %2180 = vperm.xlu2 %2458, %v1234_v57  }
 0x152   :  { %2313 = vmatmul.msk.f32.gmra.mxu1 %vm881_vm7, %v723_v33 }
 0x154   :  { %v3569_v47 = vpop.f32.mrf.mxu0 }
 0x15a   :  { %2314 = vmatmul.msk.f32.gmra.mxu1 %vm881_vm7, %v724_v17 }
 0x15d   :  { %v3577_v62 = vpop.f32.mrf.mxu0 }
 0x15f   :  { %v3549_v43 = vpop.f32.mrf.mxu1 }
 0x160   :  { %4224 = vst [vmem:[#allocation9_spill] sm:$0xff] %v3549_v43 }
 0x162   :  { %2315 = vmatmul.msk.f32.gmra.mxu1 %vm881_vm7, %v725_v40 }
 0x165   :  { %v3585_v51 = vpop.f32.mrf.mxu0  ;;  %v1120_v15 = vpop.f32.mrf.mxu3 }
 0x166   :  { %v1034_v0 = vpop.f32.mrf.mxu2  ;;  %v1121_v28 = vadd.f32 %v1120_v15, %v864_v55 }
 0x167   :  { %v3559_v11 = vpop.f32.mrf.mxu1  ;;  %v1035_v23 = vadd.f32 %v1034_v0, %v869_v41 }
 0x16a   :  { %2316 = vmatmul.msk.f32.gmra.mxu1 %vm881_vm7, %v726_v42 }
 0x16d   :  { %v3589_v63 = vpop.f32.mrf.mxu0  ;;  %v1123_v35 = vpop.f32.mrf.mxu3 }
 0x16e   :  { %v1124_v14 = vadd.f32 %v1123_v35, %v869_v41  ;;  %v1037_v1 = vpop.f32.mrf.mxu2 }
 0x16f   :  { %v3567_v49 = vpop.f32.mrf.mxu1  ;;  %v1038_v38 = vadd.f32 %v1037_v1, %v874_v19 }
 0x172   :  { %2317 = vmatmul.msk.f32.gmra.mxu1 %vm881_vm7, %v727_v22 }
 0x175   :  { %v3593_v2 = vpop.f32.mrf.mxu0  ;;  %v1126_v12 = vpop.f32.mrf.mxu3 }
 0x176   :  { %v1127_v21 = vadd.f32 %v1126_v12, %v874_v19  ;;  %v1040_v42 = vpop.f32.mrf.mxu2 }
 0x177   :  { %v3575_v27 = vpop.f32.mrf.mxu1  ;;  %v1041_v52 = vadd.f32 %v1040_v42, %v879_v34 }
 0x17a   :  { %2318 = vmatmul.msk.f32.gmra.mxu1 %vm881_vm7, %v728_v6 }
 0x17d   :  { %v3597_v44 = vpop.f32.mrf.mxu0  ;;  %v1129_v5 = vpop.f32.mrf.mxu3 }
 0x17e   :  { %v1130_v33 = vadd.f32 %v1129_v5, %v879_v34  ;;  %v854_v34 = vpop.permute.xlu2 %853 }
 0x17f   :  { %v3583_v61 = vpop.f32.mrf.mxu1 }
 0x180   :  { %2459 = vtanh.f32 %v1130_v33  ;;  %v844_v33 = vpop.permute.xlu1 %843 }
 0x181   :  { %2461 = vtanh.f32 %v1124_v14  ;;  %v849_v14 = vpop.permute.xlu0 %848 }
 0x182   :  { %2463 = vtanh.f32 %v1127_v21 }
 0x183   :  { %2465 = vtanh.f32 %v1121_v28 }
 0x184   :  { %2467 = vtanh.f32 %v1038_v38 }
 0x185   :  { %v3601_v8 = vpop.f32.mrf.mxu0  ;;  %2469 = vtanh.f32 %v1041_v52 }
 0x186   :  { %v2460_v32 = vpop.eup %2459  ;;  %2471 = vtanh.f32 %v1035_v23  ;;  %v1302_v23 = vld [vmem:[%s4203_s3 + $0x8] sm:$0xff] }
 0x187   :  { %v3587_v39 = vpop.f32.mrf.mxu1  ;;  %v2462_v20 = vpop.eup %2461  ;;  %1431 = vmatpush.msrb.mxu3 %v2460_v32 }
 0x188   :  { %v2464_v37 = vpop.eup %2463 }
 0x189   :  { %1432 = vmatpush.msrb.mxu3 %v2464_v37  ;;  %v2466_v50 = vpop.eup %2465  ;;  %v1301_v37 = vld [vmem:[%s4203_s3] sm:$0xff] }
 0x18a   :  { %v2468_v13 = vpop.eup %2467 }
 0x18b   :  { %1433 = vmatpush.msrb.mxu3 %v2462_v20  ;;  %v2470_v4 = vpop.eup %2469 }
 0x18c   :  { %1390 = vmatpush.msrb.mxu2 %v2470_v4  ;;  %v2472_v58 = vpop.eup %2471  ;;  %v1303_v4 = vld [vmem:[%s4203_s3 + $0x10] sm:$0xff] }
 0x18d   :  { %v3605_v60 = vpop.f32.mrf.mxu0  ;;  %1434 = vmatpush.msrb.mxu3 %v2466_v50 }
 0x18e   :  { %1391 = vmatpush.msrb.mxu2 %v2468_v13 }
 0x18f   :  { %v3591_v3 = vpop.f32.mrf.mxu1 }
 0x190   :  { %1392 = vmatpush.msrb.mxu2 %v2472_v58 }
 0x195   :  { %v3609_v48 = vpop.f32.mrf.mxu0 }
 0x197   :  { %v3595_v54 = vpop.f32.mrf.mxu1 }
 0x19d   :  { %v3613_v18 = vpop.f32.mrf.mxu0 }
 0x19f   :  { %v3599_v7 = vpop.f32.mrf.mxu1 }
 0x1a5   :  { %v1019_v31 = vpop.f32.mrf.mxu0 }
 0x1a6   :  { %v1020_v19 = vadd.f32 %v1019_v31, %v844_v33 }
 0x1a7   :  { %v3603_v9 = vpop.f32.mrf.mxu1 }
 0x1ad   :  { %v1022_v22 = vpop.f32.mrf.mxu0 }
 0x1ae   :  { %v1023_v5 = vadd.f32 %v1022_v22, %v849_v14 }
 0x1af   :  { %v3607_v59 = vpop.f32.mrf.mxu1 }
 0x1b5   :  { %v1025_v6 = vpop.f32.mrf.mxu0 }
 0x1b6   :  { %v1026_v12 = vadd.f32 %v1025_v6, %v854_v34 }
 0x1b7   :  { %v3611_v17 = vpop.f32.mrf.mxu1 }
 0x1bd   :  { %v1028_v53 = vpop.f32.mrf.mxu0 }
 0x1be   :  { %v1029_v41 = vadd.f32 %v1028_v53, %v859_v56  ;;  %v1304_v53 = vld [vmem:[%s4203_s3 + $0x18] sm:$0xff] }
 0x1bf   :  { %v3615_v40 = vpop.f32.mrf.mxu1 }
 0x1c5   :  { %v1031_v15 = vpop.f32.mrf.mxu0 }
 0x1c6   :  { %v1032_v35 = vadd.f32 %v1031_v15, %v864_v55  ;;  %v1307_v15 = vld [vmem:[%s4203_s3 + $0x30] sm:$0xff] }
 0x1c7   :  { %v3617_v30 = vpop.f32.mrf.mxu1 }
 0x1c8   :  { %2473 = vtanh.f32 %v1032_v35  ;;  %v1308_v35 = vld [vmem:[%s4203_s3 + $0x38] sm:$0xff] }
 0x1c9   :  { %2475 = vtanh.f32 %v1029_v41  ;;  %v3663_v41 = vpop.permute.xlu1 %793 }
 0x1ca   :  { %2477 = vtanh.f32 %v1026_v12  ;;  %v3667_v12 = vpop.permute.xlu2 %798 }
 0x1cb   :  { %2479 = vtanh.f32 %v1023_v5 }
 0x1cc   :  { %2481 = vtanh.f32 %v1020_v19 }
 0x1ce   :  { %v2474_v28 = vpop.eup %2473 }
 0x1cf   :  { %v3619_v25 = vpop.f32.mrf.mxu1  ;;  %1393 = vmatpush.msrb.mxu2 %v2474_v28  ;;  %v2476_v21 = vpop.eup %2475 }
 0x1d0   :  { %v2478_v32 = vpop.eup %2477 }
 0x1d1   :  { %1394 = vmatpush.msrb.mxu2 %v2476_v21  ;;  %v2480_v55 = vpop.eup %2479 }
 0x1d2   :  { %v2482_v1 = vpop.eup %2481  ;;  %v3673_v19 = vpop.permute.xlu2 %833 }
 0x1d3   :  { %1395 = vmatpush.msrb.mxu2 %v2478_v32 }
 0x1d5   :  { %1396 = vmatpush.msrb.mxu2 %v2480_v55 }
 0x1d7   :  { %v3621_v10 = vpop.f32.mrf.mxu1  ;;  %1397 = vmatpush.msrb.mxu2 %v2482_v1 }
 0x1d8   :  { %2323 = vmatmul.msk.f32.vlgmr.msrb.gmra.mxu2 %vm1357_vm12, %v1301_v37 }
 0x1da   :  { %v3679_v32 = vpop.permute.xlu2 %828 }
 0x1df   :  { %v1108_v57 = vpop.f32.mrf.mxu1 }
 0x1e0   :  { %2324 = vmatmul.msk.f32.gmra.mxu2 %vm1357_vm12, %v1302_v23  ;;  %v1109_v52 = vadd.f32 %v1108_v57, %v844_v33  ;;  %v1306_v57 = vld [vmem:[%s4203_s3 + $0x28] sm:$0xff] }
 0x1e7   :  { %v1111_v0 = vpop.f32.mrf.mxu1 }
 0x1e8   :  { %v1112_v42 = vadd.f32 %v1111_v0, %v849_v14  ;;  %2325 = vmatmul.msk.f32.gmra.mxu2 %vm1357_vm12, %v1303_v4  ;;  %v3669_v14 = vpop.permute.xlu0 %838 }
 0x1ef   :  { %v1114_v20 = vpop.f32.mrf.mxu1 }
 0x1f0   :  { %v1115_v50 = vadd.f32 %v1114_v20, %v854_v34  ;;  %2326 = vmatmul.msk.f32.gmra.mxu2 %vm1357_vm12, %v1304_v53  ;;  %v3665_v34 = vpop.permute.xlu1 %788  ;;  %v3675_v0 = vpop.permute.xlu0 %1354 }
 0x1f7   :  { %v1117_v31 = vpop.f32.mrf.mxu1 }
 0x1f8   :  { %v1118_v38 = vadd.f32 %v1117_v31, %v859_v56  ;;  %v1305_v56 = vld [vmem:[%s4203_s3 + $0x20] sm:$0xff]  ;;  %v784_v5 = vpop.permute.xlu1 %783  ;;  %v3681_v55 = vpop.permute.xlu0 %1349 }
 0x1f9   :  { %2327 = vmatmul.msk.f32.gmra.mxu2 %vm1357_vm12, %v1305_v56 }
 0x1fa   :  { %2483 = vtanh.f32 %v1118_v38 }
 0x1fb   :  { %2485 = vtanh.f32 %v1115_v50 }
 0x1fc   :  { %2487 = vtanh.f32 %v1112_v42 }
 0x1fd   :  { %2489 = vtanh.f32 %v1109_v52 }
 0x200   :  { %v2484_v22 = vpop.eup %2483  ;;  %v779_v28 = vpop.permute.xlu1 %778 }
 0x201   :  { %1435 = vmatpush.msrb.mxu3 %v2484_v22  ;;  %v2486_v13 = vpop.eup %2485  ;;  %2328 = vmatmul.msk.f32.gmra.mxu2 %vm1357_vm12, %v1306_v57  ;;  %v3689_v50 = vpop.permute.xlu0 %1344 }
 0x202   :  { %v2488_v6 = vpop.eup %2487 }
 0x203   :  { %1436 = vmatpush.msrb.mxu3 %v2486_v13  ;;  %v2490_v58 = vpop.eup %2489 }
 0x205   :  { %1437 = vmatpush.msrb.mxu3 %v2488_v6 }
 0x207   :  { %1438 = vmatpush.msrb.mxu3 %v2490_v58 }
 0x208   :  { %2331 = vmatmul.msk.f32.vlgmr.msrb.gmra.mxu3 %vm1357_vm12, %v1301_v37  ;;  %v774_v20 = vpop.permute.xlu1 %773  ;;  %v3685_v37 = vpop.permute.xlu2 %823 }
 0x209   :  { %2329 = vmatmul.msk.f32.gmra.mxu2 %vm1357_vm12, %v1307_v15  ;;  %v3697_v22 = vpop.permute.xlu0 %1339 }
 0x210   :  { %2332 = vmatmul.msk.f32.gmra.mxu3 %vm1357_vm12, %v1302_v23  ;;  %v769_v38 = vpop.permute.xlu1 %768  ;;  %v3695_v52 = vpop.permute.xlu2 %818 }
 0x211   :  { %2330 = vmatmul.msk.f32.gmra.mxu2 %vm1357_vm12, %v1308_v35  ;;  %v3712_v43 = vpop.permute.xlu0 %1334 }
 0x218   :  { %2333 = vmatmul.msk.f32.gmra.mxu3 %vm1357_vm12, %v1303_v4  ;;  %v3699_v4 = vpop.permute.xlu1 %763  ;;  %v3709_v45 = vpop.permute.xlu2 %813 }
 0x219   :  { %v972_v6 = vadd.f32 %v3488_v16, %v3699_v4  ;;  %v987_v16 = vadd.f32 %v3561_v29, %v3665_v34  ;;  %v1073_v29 = vadd.f32 %v3583_v61, %v784_v5  ;;  %v1017_v61 = vadd.f32 %v3613_v18, %v3669_v14 }
 0x21b   :  { %2491 = vtanh.f32 %v972_v6 }
 0x220   :  { %2334 = vmatmul.msk.f32.gmra.mxu3 %vm1357_vm12, %v1304_v53  ;;  %v975_v53 = vadd.f32 %v3504_v26, %v769_v38  ;;  %v1067_v26 = vadd.f32 %v3567_v49, %v774_v20 }
 0x221   :  { %v3722_v6 = vpop.eup %2491 }
 0x222   :  { %2493 = vtanh.f32 %v975_v53  ;;  %v3745_v53 = vpop.permute.xlu0 %1329 }
 0x228   :  { %2335 = vmatmul.msk.f32.gmra.mxu3 %vm1357_vm12, %v1305_v56  ;;  %v978_v56 = vadd.f32 %v3520_v24, %v774_v20  ;;  %v990_v24 = vadd.f32 %v3569_v47, %v3663_v41  ;;  %v1008_v47 = vadd.f32 %v3601_v8, %v3685_v37  ;;  %v1011_v8 = vadd.f32 %v3605_v60, %v3679_v32 }
 0x229   :  { %v1005_v60 = vadd.f32 %v3597_v44, %v3695_v52 }
 0x22a   :  { %2495 = vtanh.f32 %v978_v56 }
 0x230   :  { %2336 = vmatmul.msk.f32.gmra.mxu3 %vm1357_vm12, %v1306_v57  ;;  %v981_v57 = vadd.f32 %v3536_v36, %v779_v28 }
 0x232   :  { %2497 = vtanh.f32 %v981_v57 }
 0x238   :  { %2337 = vmatmul.msk.f32.gmra.mxu3 %vm1357_vm12, %v1307_v15 }
 0x240   :  { %2338 = vmatmul.msk.f32.gmra.mxu3 %vm1357_vm12, %v1308_v35  ;;  %v984_v35 = vadd.f32 %v3551_v46, %v784_v5  ;;  %v1070_v46 = vadd.f32 %v3575_v27, %v779_v28  ;;  %v1014_v27 = vadd.f32 %v3609_v48, %v3673_v19 }
 0x242   :  { %2499 = vtanh.f32 %v984_v35 }
 0x25b   :  { %v3671_v33 = vpop.f32.mrf.mxu2 }
 0x263   :  { %v3677_v21 = vpop.f32.mrf.mxu2 }
 0x26b   :  { %v3683_v1 = vpop.f32.mrf.mxu2 }
 0x273   :  { %v3691_v42 = vpop.f32.mrf.mxu2 }
 0x27c   :  { %v1411_v13 = vpop.f32.mrf.mxu2 }
 0x284   :  { %v1414_v15 = vpop.f32.mrf.mxu2 }
 0x285   :  { %v1415_v18 = vadd.f32 %v1414_v15, %v3689_v50  ;;  %v1002_v15 = vadd.f32 %v3593_v2, %v3709_v45 }
 0x28b   :  { %v3687_v31 = vpop.f32.mrf.mxu3 }
 0x28c   :  { %4225 = vst [vmem:[#allocation10_spill] sm:$0xff] %v3687_v31  ;;  %v1064_v31 = vadd.f32 %v3559_v11, %v769_v38  ;;  %v993_v11 = vadd.f32 %v3577_v62, %v3667_v12  ;;  %v3726_v38 = vpop.eup %2493  ;;  %v1417_v49 = vpop.f32.mrf.mxu2 }
 0x28d   :  { %v3729_v20 = vpop.eup %2495  ;;  %v3739_v62 = vpop.permute.xlu2 %808  ;;  %v1418_v57 = vadd.f32 %v1417_v49, %v3681_v55 }
 0x28e   :  { %2501 = vtanh.f32 %v1064_v31  ;;  %v3733_v31 = vpop.eup %2497 }
 0x28f   :  { %2503 = vtanh.f32 %v987_v16  ;;  %v3737_v28 = vpop.eup %2499 }
 0x290   :  { %2505 = vtanh.f32 %v1067_v26 }
 0x291   :  { %2507 = vtanh.f32 %v990_v24 }
 0x292   :  { %2509 = vtanh.f32 %v1070_v46 }
 0x293   :  { %v3693_v23 = vpop.f32.mrf.mxu3  ;;  %2511 = vtanh.f32 %v993_v11  ;;  %v1412_v11 = vadd.f32 %v1411_v13, %v3697_v22 }
 0x294   :  { %v3743_v5 = vpop.eup %2501  ;;  %2513 = vtanh.f32 %v1073_v29  ;;  %v1420_v24 = vpop.f32.mrf.mxu2 }
 0x295   :  { %4226 = vst [vmem:[#allocation11_spill] sm:$0xff] %v3743_v5  ;;  %v3749_v56 = vpop.eup %2503  ;;  %2515 = vtanh.f32 %v1008_v47  ;;  %v1421_v29 = vadd.f32 %v1420_v24, %v3675_v0  ;;  %v3785_v5 = vpop.permute.xlu1 %1319 }
 0x296   :  { %v3754_v35 = vpop.eup %2505  ;;  %2517 = vtanh.f32 %v1014_v27  ;;  %v1409_v27 = vadd.f32 %v3691_v42, %v3712_v43 }
 0x297   :  { %4227 = vst [vmem:[#allocation12_spill] sm:$0xff] %v3754_v35  ;;  %v3757_v16 = vpop.eup %2507  ;;  %2519 = vtanh.f32 %v1017_v61  ;;  %v999_v61 = vadd.f32 %v3589_v63, %v3739_v62  ;;  %v1400_v35 = vadd.f32 %v3671_v33, %v3785_v5 }
 0x298   :  { %v3759_v26 = vpop.eup %2509  ;;  %2521 = vtanh.f32 %v1011_v8  ;;  %v3775_v8 = vpop.permute.xlu2 %803 }
 0x299   :  { %4228 = vst [vmem:[#allocation13_spill] sm:$0xff] %v3759_v26  ;;  %v3763_v46 = vpop.eup %2511  ;;  %2523 = vtanh.f32 %v1418_v57  ;;  %v1406_v57 = vadd.f32 %v3683_v1, %v3745_v53  ;;  %v996_v42 = vadd.f32 %v3585_v51, %v3775_v8 }
 0x29a   :  { %v3767_v49 = vpop.eup %2513  ;;  %2525 = vtanh.f32 %v1415_v18  ;;  %v3781_v18 = vpop.permute.xlu0 %1324 }
 0x29b   :  { %v3703_v58 = vpop.f32.mrf.mxu3  ;;  %4229 = vst [vmem:[#allocation14_spill] sm:$0xff] %v3767_v49  ;;  %v2516_v47 = vpop.eup %2515  ;;  %2527 = vtanh.f32 %v1421_v29  ;;  %v1403_v63 = vadd.f32 %v3677_v21, %v3781_v18 }
 0x29c   :  { %v2518_v44 = vpop.eup %2517  ;;  %2529 = vtanh.f32 %v1005_v60  ;;  %v3807_v49 = vsub.f32 %v2516_v47, %v3737_v28 }
 0x29d   :  { %v2520_v13 = vpop.eup %2519  ;;  %2531 = vtanh.f32 %v1412_v11  ;;  %v3790_v1 = vsub.f32 %v2518_v44, %v3757_v16 }
 0x29e   :  { %v2522_v2 = vpop.eup %2521  ;;  %2533 = vtanh.f32 %v1002_v15  ;;  %v3793_v11 = vsub.f32 %v2520_v13, %v3763_v46  ;;  %v1076_v15 = vadd.f32 %v3587_v39, %v3665_v34  ;;  %v1079_v13 = vadd.f32 %v3591_v3, %v3663_v41 }
 0x29f   :  { %v2524_v29 = vpop.eup %2523  ;;  %2535 = vtanh.f32 %v1409_v27  ;;  %v3800_v21 = vsub.f32 %v2522_v2, %v3749_v56  ;;  %v1082_v2 = vadd.f32 %v3595_v54, %v3667_v12  ;;  %v1097_v3 = vadd.f32 %v3615_v40, %v3685_v37 }
 0x2a0   :  { %v2526_v60 = vpop.eup %2525  ;;  %2537 = vtanh.f32 %v999_v61  ;;  %v1492_v44 = vmul.f32 %v2524_v29, %v3790_v1  ;;  %v1106_v12 = vadd.f32 %v3621_v10, %v3669_v14 }
 0x2a1   :  { %v2528_v51 = vpop.eup %2527  ;;  %2539 = vtanh.f32 %v1406_v57  ;;  %v1490_v34 = vmul.f32 %v2526_v60, %v3800_v21 }
 0x2a2   :  { %v2530_v26 = vpop.eup %2529  ;;  %2541 = vtanh.f32 %v996_v42  ;;  %v1494_v27 = vmul.f32 %v2528_v51, %v3793_v11  ;;  %v1508_v41 = vadd.f32 %v3757_v16, %v1492_v44 }
 0x2a3   :  { %v3719_v36 = vpop.f32.mrf.mxu3  ;;  %v2532_v61 = vpop.eup %2531  ;;  %2543 = vtanh.f32 %v1403_v63  ;;  %v3814_v51 = vsub.f32 %v2530_v26, %v3733_v31  ;;  %v1103_v63 = vadd.f32 %v3619_v25, %v3673_v19  ;;  %v1506_v40 = vadd.f32 %v3749_v56, %v1490_v34 }
 0x2a4   :  { %v2534_v33 = vpop.eup %2533  ;;  %2545 = vtanh.f32 %v1400_v35  ;;  %v1510_v39 = vadd.f32 %v3763_v46, %v1494_v27  ;;  %v1488_v35 = vmul.f32 %v2532_v61, %v3807_v49  ;;  %v1100_v25 = vadd.f32 %v3617_v30, %v3679_v32 }
 0x2a5   :  { %v2536_v57 = vpop.eup %2535  ;;  %2547 = vtanh.f32 %v1076_v15  ;;  %v3823_v54 = vsub.f32 %v2534_v33, %v3729_v20  ;;  %v1094_v33 = vadd.f32 %v3611_v17, %v3695_v52  ;;  %v1450_v52 = vadd.f32 %v3719_v36, %v3712_v43 }
 0x2a6   :  { %v2538_v29 = vpop.eup %2537  ;;  %1602 = vmatpush.msra.mxu2 %v1510_v39  ;;  %2549 = vtanh.f32 %v1079_v13  ;;  %v1486_v37 = vmul.f32 %v2536_v57, %v3814_v51  ;;  %v1504_v10 = vadd.f32 %v3737_v28, %v1488_v35  ;;  %v1085_v43 = vadd.f32 %v3599_v7, %v3775_v8  ;;  %v4231_v8 = vld [vmem:[#allocation10_spill] sm:$0xff] }
 0x2a7   :  { %v2540_v47 = vpop.eup %2539  ;;  %2551 = vtanh.f32 %v1082_v2  ;;  %v3830_v15 = vsub.f32 %v2538_v29, %v3726_v38 }
 0x2a8   :  { %v2542_v60 = vpop.eup %2541  ;;  %1603 = vmatpush.msra.mxu2 %v1508_v41  ;;  %2553 = vtanh.f32 %v1097_v3  ;;  %v1484_v14 = vmul.f32 %v2540_v47, %v3823_v54  ;;  %v1502_v30 = vadd.f32 %v3733_v31, %v1486_v37  ;;  %v1447_v3 = vadd.f32 %v3703_v58, %v3745_v53  ;;  %v4232_v37 = vld [vmem:[#allocation14_spill] sm:$0xff] }
 0x2a9   :  { %v2544_v26 = vpop.eup %2543  ;;  %v3840_v61 = vsub.f32 %v2542_v60, %v3722_v6  ;;  %2555 = vtanh.f32 %v1103_v63  ;;  %v1444_v41 = vadd.f32 %v3693_v23, %v3781_v18  ;;  %v1441_v18 = vadd.f32 %v4231_v8, %v3785_v5  ;;  %v2345_v8 = vld [vmem:[%s4203_s3 + $0x70] sm:$0xff] }
 0x2aa   :  { %v2546_v19 = vpop.eup %2545  ;;  %1604 = vmatpush.msra.mxu2 %v1506_v40  ;;  %2557 = vtanh.f32 %v1106_v12  ;;  %v1482_v32 = vmul.f32 %v2544_v26, %v3830_v15 }
 0x2ab   :  { %v3751_v48 = vpop.f32.mrf.mxu3  ;;  %v3837_v44 = vpop.eup %2547  ;;  %2559 = vtanh.f32 %v1100_v25  ;;  %v1480_v34 = vmul.f32 %v2546_v19, %v3840_v61 }
 0x2ac   :  { %1605 = vmatpush.msra.mxu2 %v1504_v10  ;;  %v1453_v57 = vadd.f32 %v3751_v48, %v3697_v22  ;;  %v1498_v22 = vadd.f32 %v3726_v38, %v1482_v32  ;;  %v4233_v10 = vld [vmem:[#allocation13_spill] sm:$0xff] }
 0x2ae   :  { %1606 = vmatpush.msra.mxu2 %v1502_v30 }
 0x2b3   :  { %v3779_v24 = vpop.f32.mrf.mxu3 }
 0x2b4   :  { %v1456_v13 = vadd.f32 %v3779_v24, %v3689_v50  ;;  %v1500_v24 = vadd.f32 %v3729_v20, %v1484_v14 }
 0x2b6   :  { %1607 = vmatpush.msra.mxu2 %v1500_v24 }
 0x2b8   :  { %1608 = vmatpush.msra.mxu2 %v1498_v22 }
 0x2bb   :  { %v1458_v42 = vpop.f32.mrf.mxu3 }
 0x2bc   :  { %v1459_v27 = vadd.f32 %v1458_v42, %v3681_v55  ;;  %v3846_v55 = vpop.eup %2549  ;;  %v1091_v42 = vadd.f32 %v3607_v59, %v3709_v45  ;;  %v1496_v45 = vadd.f32 %v3722_v6, %v1480_v34  ;;  %v4234_v34 = vld [vmem:[#allocation12_spill] sm:$0xff] }
 0x2bd   :  { %v3855_v2 = vpop.eup %2551 }
 0x2be   :  { %2561 = vtanh.f32 %v1459_v27  ;;  %v2554_v17 = vpop.eup %2553  ;;  %1609 = vmatpush.msra.mxu2 %v1496_v45 }
 0x2bf   :  { %2563 = vtanh.f32 %v1456_v13  ;;  %v2556_v48 = vpop.eup %2555  ;;  %v3891_v26 = vsub.f32 %v2554_v17, %v4232_v37 }
 0x2c0   :  { %v2558_v29 = vpop.eup %2557  ;;  %v3877_v35 = vsub.f32 %v2556_v48, %v3846_v55 }
 0x2c1   :  { %v2560_v59 = vpop.eup %2559  ;;  %v3880_v7 = vsub.f32 %v2558_v29, %v3855_v2 }
 0x2c2   :  { %v3886_v63 = vsub.f32 %v2560_v59, %v3837_v44 }
 0x2c3   :  { %v1461_v39 = vpop.f32.mrf.mxu3 }
 0x2c4   :  { %v1462_v50 = vadd.f32 %v1461_v39, %v3675_v0  ;;  %v1088_v0 = vadd.f32 %v3603_v9, %v3739_v62  ;;  %v2562_v36 = vpop.eup %2561  ;;  %v2339_v9 = vld [vmem:[%s4203_s3 + $0x40] sm:$0xff]  ;;  %v4230_v62 = vld [vmem:[#allocation9_spill] sm:$0xff] }
 0x2c5   :  { %v2564_v58 = vpop.eup %2563  ;;  %v1061_v53 = vadd.f32 %v4230_v62, %v3699_v4  ;;  %2355 = vmatmul.msk.f32.vlgmr.msra.gmra.mxu2 %vm1357_vm12, %v2339_v9  ;;  %v1493_v60 = vmul.f32 %v2562_v36, %v3877_v35 }
 0x2c6   :  { %2565 = vtanh.f32 %v1462_v50  ;;  %v1491_v5 = vmul.f32 %v2564_v58, %v3886_v63 }
 0x2c7   :  { %2567 = vtanh.f32 %v1094_v33  ;;  %v1509_v13 = vadd.f32 %v3846_v55, %v1493_v60  ;;  %v2340_v33 = vld [vmem:[%s4203_s3 + $0x48] sm:$0xff] }
 0x2c8   :  { %2569 = vtanh.f32 %v1453_v57  ;;  %v1507_v50 = vadd.f32 %v3837_v44, %v1491_v5 }
 0x2c9   :  { %2571 = vtanh.f32 %v1091_v42 }
 0x2ca   :  { %2573 = vtanh.f32 %v1450_v52  ;;  %v4235_v52 = vld [vmem:[#allocation11_spill] sm:$0xff] }
 0x2cb   :  { %2575 = vtanh.f32 %v1088_v0 }
 0x2cc   :  { %v2566_v23 = vpop.eup %2565  ;;  %2577 = vtanh.f32 %v1447_v3 }
 0x2cd   :  { %v2568_v47 = vpop.eup %2567  ;;  %2579 = vtanh.f32 %v1085_v43  ;;  %v1495_v4 = vmul.f32 %v2566_v23, %v3880_v7  ;;  %2356 = vmatmul.msk.f32.gmra.mxu2 %vm1357_vm12, %v2340_v33  ;;  %v2343_v23 = vld [vmem:[%s4203_s3 + $0x60] sm:$0xff] }
 0x2ce   :  { %v2570_v12 = vpop.eup %2569  ;;  %2581 = vtanh.f32 %v1444_v41  ;;  %v3896_v14 = vsub.f32 %v2568_v47, %v4233_v10  ;;  %v2341_v41 = vld [vmem:[%s4203_s3 + $0x50] sm:$0xff] }
 0x2cf   :  { %v2572_v40 = vpop.eup %2571  ;;  %2583 = vtanh.f32 %v1061_v53  ;;  %v1511_v25 = vadd.f32 %v3855_v2, %v1495_v4  ;;  %v1489_v30 = vmul.f32 %v2570_v12, %v3891_v26  ;;  %v2342_v53 = vld [vmem:[%s4203_s3 + $0x58] sm:$0xff] }
 0x2d0   :  { %v2574_v19 = vpop.eup %2573  ;;  %2585 = vtanh.f32 %v1441_v18  ;;  %v3904_v57 = vsub.f32 %v2572_v40, %v4234_v34  ;;  %v2346_v18 = vld [vmem:[%s4203_s3 + $0x78] sm:$0xff] }
 0x2d1   :  { %v2576_v27 = vpop.eup %2575  ;;  %1643 = vmatpush.msra.mxu3 %v1511_v25  ;;  %v1487_v24 = vmul.f32 %v2574_v19, %v3896_v14  ;;  %v1505_v48 = vadd.f32 %v4232_v37, %v1489_v30  ;;  %v1563_v30 = vpop.permute.xlu0 %1562 }
 0x2d2   :  { %v2578_v32 = vpop.eup %2577  ;;  %v3912_v22 = vsub.f32 %v2576_v27, %v4235_v52 }
 0x2d3   :  { %v2580_v39 = vpop.eup %2579  ;;  %1644 = vmatpush.msra.mxu3 %v1509_v13  ;;  %v1485_v0 = vmul.f32 %v2578_v32, %v3904_v57  ;;  %v1503_v45 = vadd.f32 %v4233_v10, %v1487_v24  ;;  %v1568_v13 = vpop.permute.xlu2 %1567 }
 0x2d4   :  { %v2582_v42 = vpop.eup %2581 }
 0x2d5   :  { %v3909_v17 = vpop.eup %2583  ;;  %1645 = vmatpush.msra.mxu3 %v1507_v50  ;;  %v1483_v59 = vmul.f32 %v2582_v42, %v3912_v22  ;;  %v1501_v43 = vadd.f32 %v4234_v34, %v1485_v0  ;;  %2357 = vmatmul.msk.f32.gmra.mxu2 %vm1357_vm12, %v2341_v41 }
 0x2d6   :  { %v2586_v29 = vpop.eup %2585  ;;  %v3917_v3 = vsub.f32 %v2580_v39, %v3909_v17  ;;  %v1558_v39 = vpop.permute.xlu1 %1557 }
 0x2d7   :  { %1646 = vmatpush.msra.mxu3 %v1505_v48  ;;  %v1499_v58 = vadd.f32 %v4235_v52, %v1483_v59 }
 0x2d8   :  { %v1481_v36 = vmul.f32 %v2586_v29, %v3917_v3 }
 0x2d9   :  { %1647 = vmatpush.msra.mxu3 %v1503_v45  ;;  %v1548_v24 = vpop.permute.xlu0 %1547 }
 0x2da   :  { %v1497_v62 = vadd.f32 %v3909_v17, %v1481_v36 }
 0x2db   :  { %1648 = vmatpush.msra.mxu3 %v1501_v43  ;;  %v1553_v50 = vpop.permute.xlu2 %1552 }
 0x2dd   :  { %1649 = vmatpush.msra.mxu3 %v1499_v58  ;;  %2358 = vmatmul.msk.f32.gmra.mxu2 %vm1357_vm12, %v2342_v53 }
 0x2de   :  { %v1543_v36 = vpop.permute.xlu1 %1542 }
 0x2df   :  { %1650 = vmatpush.msra.mxu3 %v1497_v62 }
 0x2e0   :  { %2363 = vmatmul.msk.f32.vlgmr.msra.gmra.mxu3 %vm1357_vm12, %v2339_v9  ;;  %v2344_v9 = vld [vmem:[%s4203_s3 + $0x68] sm:$0xff] }
 0x2e3   :  { %v1538_v62 = vpop.permute.xlu2 %1537 }
 0x2e5   :  { %2359 = vmatmul.msk.f32.gmra.mxu2 %vm1357_vm12, %v2343_v23 }
 0x2e8   :  { %2364 = vmatmul.msk.f32.gmra.mxu3 %vm1357_vm12, %v2340_v33 }
 0x2ed   :  { %2360 = vmatmul.msk.f32.gmra.mxu2 %vm1357_vm12, %v2344_v9 }
 0x2f0   :  { %2365 = vmatmul.msk.f32.gmra.mxu3 %vm1357_vm12, %v2341_v41 }
 0x2f5   :  { %2361 = vmatmul.msk.f32.gmra.mxu2 %vm1357_vm12, %v2345_v8 }
 0x2f8   :  { %2366 = vmatmul.msk.f32.gmra.mxu3 %vm1357_vm12, %v2342_v53 }
 0x2fd   :  { %2362 = vmatmul.msk.f32.gmra.mxu2 %vm1357_vm12, %v2346_v18 }
 0x300   :  { %2367 = vmatmul.msk.f32.gmra.mxu3 %vm1357_vm12, %v2343_v23  ;;  %v1533_v23 = vpop.permute.xlu0 %1532 }
 0x308   :  { %2368 = vmatmul.msk.f32.gmra.mxu3 %vm1357_vm12, %v2344_v9 }
 0x310   :  { %2369 = vmatmul.msk.f32.gmra.mxu3 %vm1357_vm12, %v2345_v8 }
 0x318   :  { %2370 = vmatmul.msk.f32.gmra.mxu3 %vm1357_vm12, %v2346_v18 }
 0x348   :  { %v1611_v47 = vpop.f32.mrf.mxu2 }
 0x349   :  { %v1612_v18 = vadd.f32 %v1611_v47, %v1533_v23 }
 0x350   :  { %v1614_v4 = vpop.f32.mrf.mxu2 }
 0x351   :  { %v1615_v9 = vadd.f32 %v1614_v4, %v1538_v62 }
 0x358   :  { %v1617_v60 = vpop.f32.mrf.mxu2 }
 0x359   :  { %v1618_v41 = vadd.f32 %v1617_v60, %v1543_v36 }
 0x360   :  { %v1620_v40 = vpop.f32.mrf.mxu2 }
 0x361   :  { %v1621_v43 = vadd.f32 %v1620_v40, %v1548_v24 }
 0x363   :  { %v3957_v12 = vpop.f32.mrf.mxu3 }
 0x368   :  { %v1623_v5 = vpop.f32.mrf.mxu2 }
 0x369   :  { %v1624_v45 = vadd.f32 %v1623_v5, %v1553_v50 }
 0x36b   :  { %v3959_v25 = vpop.f32.mrf.mxu3 }
 0x370   :  { %v1626_v27 = vpop.f32.mrf.mxu2 }
 0x371   :  { %v1627_v0 = vadd.f32 %v1626_v27, %v1558_v39 }
 0x373   :  { %v3961_v19 = vpop.f32.mrf.mxu3 }
 0x378   :  { %v1629_v33 = vpop.f32.mrf.mxu2 }
 0x379   :  { %v1630_v48 = vadd.f32 %v1629_v33, %v1563_v30 }
 0x37b   :  { %v1661_v32 = vpop.f32.mrf.mxu3  ;;  %2587 = vtanh.f32 %v1630_v48 }
 0x37c   :  { %2589 = vtanh.f32 %v1627_v0 }
 0x380   :  { %v1632_v29 = vpop.f32.mrf.mxu2 }
 0x381   :  { %v1633_v59 = vadd.f32 %v1632_v29, %v1568_v13  ;;  %v2588_v53 = vpop.eup %2587 }
 0x382   :  { %v2590_v8 = vpop.eup %2589  ;;  %v1704_v27 = vmul.f32 %v2588_v53, %v3790_v1 }
 0x383   :  { %v1664_v42 = vpop.f32.mrf.mxu3  ;;  %2591 = vtanh.f32 %v1633_v59  ;;  %v1702_v40 = vmul.f32 %v2590_v8, %v3800_v21 }
 0x384   :  { %2593 = vtanh.f32 %v1624_v45  ;;  %v1720_v4 = vadd.f32 %v3757_v16, %v1704_v27 }
 0x385   :  { %2595 = vtanh.f32 %v1621_v43  ;;  %v1718_v59 = vadd.f32 %v3749_v56, %v1702_v40  ;;  %v1665_v40 = vadd.f32 %v1664_v42, %v1553_v50  ;;  %v1656_v50 = vadd.f32 %v3959_v25, %v1538_v62 }
 0x386   :  { %2597 = vtanh.f32 %v1618_v41  ;;  %v1653_v42 = vadd.f32 %v3957_v12, %v1533_v23  ;;  %v2372_v12 = vld [vmem:[%s4203_s3 + $0x88] sm:$0xff] }
 0x387   :  { %2599 = vtanh.f32 %v1615_v9 }
 0x388   :  { %2601 = vtanh.f32 %v1612_v18 }
 0x389   :  { %v2592_v33 = vpop.eup %2591 }
 0x38a   :  { %v1706_v5 = vmul.f32 %v2592_v33, %v3793_v11  ;;  %v2594_v48 = vpop.eup %2593 }
 0x38b   :  { %v1667_v58 = vpop.f32.mrf.mxu3  ;;  %v2596_v0 = vpop.eup %2595  ;;  %v1700_v47 = vmul.f32 %v2594_v48, %v3807_v49 }
 0x38c   :  { %v1722_v60 = vadd.f32 %v3763_v46, %v1706_v5  ;;  %v2598_v45 = vpop.eup %2597  ;;  %v1698_v43 = vmul.f32 %v2596_v0, %v3814_v51  ;;  %v1668_v33 = vadd.f32 %v1667_v58, %v1558_v39  ;;  %v1659_v58 = vadd.f32 %v3961_v19, %v1543_v36 }
 0x38d   :  { %v2600_v41 = vpop.eup %2599  ;;  %v1716_v18 = vadd.f32 %v3737_v28, %v1700_v47  ;;  %v1696_v8 = vmul.f32 %v2598_v45, %v3823_v54 }
 0x38e   :  { %1814 = vmatpush.msrb.mxu2 %v1722_v60  ;;  %v2602_v53 = vpop.eup %2601  ;;  %v1714_v5 = vadd.f32 %v3733_v31, %v1698_v43  ;;  %v1694_v27 = vmul.f32 %v2600_v41, %v3830_v15 }
 0x38f   :  { %v1692_v60 = vmul.f32 %v2602_v53, %v3840_v61 }
 0x390   :  { %1815 = vmatpush.msrb.mxu2 %v1720_v4  ;;  %v1710_v39 = vadd.f32 %v3726_v38, %v1694_v27 }
 0x391   :  { %v1708_v4 = vadd.f32 %v3722_v6, %v1692_v60 }
 0x392   :  { %1816 = vmatpush.msrb.mxu2 %v1718_v59 }
 0x393   :  { %v1670_v29 = vpop.f32.mrf.mxu3 }
 0x394   :  { %v1671_v9 = vadd.f32 %v1670_v29, %v1563_v30  ;;  %1817 = vmatpush.msrb.mxu2 %v1716_v18  ;;  %v1712_v30 = vadd.f32 %v3729_v20, %v1696_v8  ;;  %v1662_v29 = vadd.f32 %v1661_v32, %v1548_v24 }
 0x396   :  { %2603 = vtanh.f32 %v1671_v9  ;;  %1818 = vmatpush.msrb.mxu2 %v1714_v5 }
 0x397   :  { %2605 = vtanh.f32 %v1668_v33 }
 0x398   :  { %1819 = vmatpush.msrb.mxu2 %v1712_v30 }
 0x39a   :  { %1820 = vmatpush.msrb.mxu2 %v1710_v39  ;;  %v2374_v39 = vld [vmem:[%s4203_s3 + $0x98] sm:$0xff] }
 0x39b   :  { %v1673_v48 = vpop.f32.mrf.mxu3 }
 0x39c   :  { %v1674_v0 = vadd.f32 %v1673_v48, %v1568_v13  ;;  %v2604_v47 = vpop.eup %2603  ;;  %v2371_v13 = vld [vmem:[%s4203_s3 + $0x80] sm:$0xff]  ;;  %1821 = vmatpush.msrb.mxu2 %v1708_v4  ;;  %v2376_v4 = vld [vmem:[%s4203_s3 + $0xa8] sm:$0xff] }
 0x39d   :  { %v2606_v32 = vpop.eup %2605  ;;  %2387 = vmatmul.msk.f32.vlgmr.msrb.gmra.mxu2 %vm1357_vm12, %v2371_v13  ;;  %v1705_v36 = vmul.f32 %v2604_v47, %v3877_v35  ;;  %v2377_v47 = vld [vmem:[%s4203_s3 + $0xb0] sm:$0xff] }
 0x39e   :  { %2607 = vtanh.f32 %v1674_v0  ;;  %v1703_v62 = vmul.f32 %v2606_v32, %v3886_v63  ;;  %v2373_v0 = vld [vmem:[%s4203_s3 + $0x90] sm:$0xff] }
 0x39f   :  { %2609 = vtanh.f32 %v1665_v40  ;;  %v1721_v43 = vadd.f32 %v3846_v55, %v1705_v36 }
 0x3a0   :  { %2611 = vtanh.f32 %v1662_v29  ;;  %v1719_v23 = vadd.f32 %v3837_v44, %v1703_v62 }
 0x3a1   :  { %2613 = vtanh.f32 %v1659_v58  ;;  %v2375_v58 = vld [vmem:[%s4203_s3 + $0xa0] sm:$0xff] }
 0x3a2   :  { %2615 = vtanh.f32 %v1656_v50  ;;  %v2378_v50 = vld [vmem:[%s4203_s3 + $0xb8] sm:$0xff] }
 0x3a3   :  { %2617 = vtanh.f32 %v1653_v42 }
 0x3a4   :  { %v2608_v24 = vpop.eup %2607 }
 0x3a5   :  { %v1707_v19 = vmul.f32 %v2608_v24, %v3880_v7  ;;  %v2610_v45 = vpop.eup %2609  ;;  %2388 = vmatmul.msk.f32.gmra.mxu2 %vm1357_vm12, %v2372_v12 }
 0x3a6   :  { %v2612_v59 = vpop.eup %2611  ;;  %v1701_v41 = vmul.f32 %v2610_v45, %v3891_v26 }
 0x3a7   :  { %v1723_v25 = vadd.f32 %v3855_v2, %v1707_v19  ;;  %v2614_v53 = vpop.eup %2613  ;;  %v1699_v9 = vmul.f32 %v2612_v59, %v3896_v14  ;;  %v4044_v59 = vpop.permute.xlu1 %1779 }
 0x3a8   :  { %v2616_v18 = vpop.eup %2615  ;;  %v1717_v8 = vadd.f32 %v4232_v37, %v1701_v41  ;;  %v1697_v33 = vmul.f32 %v2614_v53, %v3904_v57 }
 0x3a9   :  { %1855 = vmatpush.msrb.mxu3 %v1723_v25  ;;  %v2618_v5 = vpop.eup %2617  ;;  %v1715_v27 = vadd.f32 %v4233_v10, %v1699_v9  ;;  %v1695_v48 = vmul.f32 %v2616_v18, %v3912_v22 }
 0x3aa   :  { %v1713_v60 = vadd.f32 %v4234_v34, %v1697_v33  ;;  %v1693_v40 = vmul.f32 %v2618_v5, %v3917_v3 }
 0x3ab   :  { %1856 = vmatpush.msrb.mxu3 %v1721_v43  ;;  %v1711_v30 = vadd.f32 %v4235_v52, %v1695_v48  ;;  %v1775_v43 = vpop.permute.xlu2 %1774 }
 0x3ac   :  { %v1709_v29 = vadd.f32 %v3909_v17, %v1693_v40 }
 0x3ad   :  { %1857 = vmatpush.msrb.mxu3 %v1719_v23  ;;  %2389 = vmatmul.msk.f32.gmra.mxu2 %vm1357_vm12, %v2373_v0 }
 0x3af   :  { %1858 = vmatpush.msrb.mxu3 %v1717_v8  ;;  %v1765_v23 = vpop.permute.xlu1 %1764 }
 0x3b1   :  { %1859 = vmatpush.msrb.mxu3 %v1715_v27 }
 0x3b3   :  { %1860 = vmatpush.msrb.mxu3 %v1713_v60  ;;  %v4048_v9 = vpop.permute.xlu2 %1759 }
 0x3b5   :  { %1861 = vmatpush.msrb.mxu3 %v1711_v30  ;;  %2390 = vmatmul.msk.f32.gmra.mxu2 %vm1357_vm12, %v2374_v39 }
 0x3b7   :  { %1862 = vmatpush.msrb.mxu3 %v1709_v29  ;;  %v1750_v29 = vpop.permute.xlu1 %1749 }
 0x3b8   :  { %2395 = vmatmul.msk.f32.vlgmr.msrb.gmra.mxu3 %vm1357_vm12, %v2371_v13 }
 0x3bd   :  { %2391 = vmatmul.msk.f32.gmra.mxu2 %vm1357_vm12, %v2375_v58 }
 0x3c0   :  { %2396 = vmatmul.msk.f32.gmra.mxu3 %vm1357_vm12, %v2372_v12  ;;  %v1770_v12 = vpop.permute.xlu0 %1769 }
 0x3c5   :  { %2392 = vmatmul.msk.f32.gmra.mxu2 %vm1357_vm12, %v2376_v4 }
 0x3c8   :  { %2397 = vmatmul.msk.f32.gmra.mxu3 %vm1357_vm12, %v2373_v0  ;;  %v1755_v40 = vpop.permute.xlu0 %1754 }
 0x3cd   :  { %2393 = vmatmul.msk.f32.gmra.mxu2 %vm1357_vm12, %v2377_v47 }
 0x3d0   :  { %2398 = vmatmul.msk.f32.gmra.mxu3 %vm1357_vm12, %v2374_v39 }
 0x3d5   :  { %2394 = vmatmul.msk.f32.gmra.mxu2 %vm1357_vm12, %v2378_v50 }
 0x3d8   :  { %2399 = vmatmul.msk.f32.gmra.mxu3 %vm1357_vm12, %v2375_v58  ;;  %v4052_v58 = vpop.permute.xlu2 %1744 }
 0x3e0   :  { %2400 = vmatmul.msk.f32.gmra.mxu3 %vm1357_vm12, %v2376_v4 }
 0x3e8   :  { %2401 = vmatmul.msk.f32.gmra.mxu3 %vm1357_vm12, %v2377_v47 }
 0x3f0   :  { %2402 = vmatmul.msk.f32.gmra.mxu3 %vm1357_vm12, %v2378_v50 }
 0x420   :  { %v1823_v13 = vpop.f32.mrf.mxu2 }
 0x421   :  { %v1824_v50 = vadd.f32 %v1823_v13, %v4052_v58 }
 0x428   :  { %v1826_v32 = vpop.f32.mrf.mxu2 }
 0x429   :  { %v1827_v4 = vadd.f32 %v1826_v32, %v1750_v29 }
 0x430   :  { %v1829_v24 = vpop.f32.mrf.mxu2 }
 0x431   :  { %v1830_v0 = vadd.f32 %v1829_v24, %v1755_v40 }
 0x438   :  { %v1832_v19 = vpop.f32.mrf.mxu2 }
 0x439   :  { %v1833_v60 = vadd.f32 %v1832_v19, %v4048_v9 }
 0x43b   :  { %v4038_v42 = vpop.f32.mrf.mxu3 }
 0x440   :  { %v1835_v45 = vpop.f32.mrf.mxu2 }
 0x441   :  { %v1836_v27 = vadd.f32 %v1835_v45, %v1765_v23 }
 0x443   :  { %v4040_v36 = vpop.f32.mrf.mxu3 }
 0x448   :  { %v1838_v62 = vpop.f32.mrf.mxu2 }
 0x449   :  { %v1839_v33 = vadd.f32 %v1838_v62, %v1770_v12 }
 0x44b   :  { %v4042_v25 = vpop.f32.mrf.mxu3 }
 0x450   :  { %v1841_v53 = vpop.f32.mrf.mxu2 }
 0x451   :  { %v1842_v8 = vadd.f32 %v1841_v53, %v1775_v43 }
 0x453   :  { %v4046_v41 = vpop.f32.mrf.mxu3  ;;  %2619 = vtanh.f32 %v1842_v8 }
 0x454   :  { %2621 = vtanh.f32 %v1839_v33 }
 0x458   :  { %v1844_v5 = vpop.f32.mrf.mxu2 }
 0x459   :  { %v1845_v48 = vadd.f32 %v1844_v5, %v4044_v59  ;;  %v2620_v39 = vpop.eup %2619 }
 0x45a   :  { %v2622_v47 = vpop.eup %2621  ;;  %v1916_v19 = vmul.f32 %v2620_v39, %v3790_v1 }
 0x45b   :  { %v1876_v18 = vpop.f32.mrf.mxu3  ;;  %2623 = vtanh.f32 %v1845_v48  ;;  %v1914_v8 = vmul.f32 %v2622_v47, %v3800_v21 }
 0x45c   :  { %2625 = vtanh.f32 %v1836_v27  ;;  %v1932_v32 = vadd.f32 %v3757_v16, %v1916_v19 }
 0x45d   :  { %2627 = vtanh.f32 %v1833_v60  ;;  %v1930_v48 = vadd.f32 %v3749_v56, %v1914_v8  ;;  %v1877_v8 = vadd.f32 %v1876_v18, %v1765_v23  ;;  %v4078_v23 = vld [vmem:[%s4203_s3 + $0xf8] sm:$0xff] }
 0x45e   :  { %2629 = vtanh.f32 %v1830_v0 }
 0x45f   :  { %2631 = vtanh.f32 %v1827_v4 }
 0x460   :  { %2633 = vtanh.f32 %v1824_v50 }
 0x461   :  { %v2624_v45 = vpop.eup %2623 }
 0x462   :  { %v1918_v62 = vmul.f32 %v2624_v45, %v3793_v11  ;;  %v2626_v53 = vpop.eup %2625 }
 0x463   :  { %v1879_v30 = vpop.f32.mrf.mxu3  ;;  %v2628_v33 = vpop.eup %2627  ;;  %v1912_v13 = vmul.f32 %v2626_v53, %v3807_v49 }
 0x464   :  { %v1934_v24 = vadd.f32 %v3763_v46, %v1918_v62  ;;  %v2630_v27 = vpop.eup %2629  ;;  %v1910_v60 = vmul.f32 %v2628_v33, %v3814_v51  ;;  %v1880_v45 = vadd.f32 %v1879_v30, %v1770_v12  ;;  %v1874_v12 = vadd.f32 %v4046_v41, %v4048_v9  ;;  %v2403_v9 = vld [vmem:[%s4203_s3 + $0xc0] sm:$0xff] }
 0x465   :  { %v2632_v0 = vpop.eup %2631  ;;  %v1928_v47 = vadd.f32 %v3737_v28, %v1912_v13  ;;  %v1908_v50 = vmul.f32 %v2630_v27, %v3823_v54  ;;  %v1868_v41 = vadd.f32 %v4040_v36, %v1750_v29 }
 0x466   :  { %2026 = vmatpush.msrb.mxu0 %v1934_v24  ;;  %2439 = vmatpush.msra.mxu2 %v1934_v24  ;;  %v2634_v39 = vpop.eup %2633  ;;  %v1926_v62 = vadd.f32 %v3733_v31, %v1910_v60  ;;  %v1906_v19 = vmul.f32 %v2632_v0, %v3830_v15 }
 0x467   :  { %v1904_v24 = vmul.f32 %v2634_v39, %v3840_v61  ;;  %v1924_v33 = vadd.f32 %v3729_v20, %v1908_v50 }
 0x468   :  { %2027 = vmatpush.msrb.mxu0 %v1932_v32  ;;  %2440 = vmatpush.msra.mxu2 %v1932_v32  ;;  %v1922_v30 = vadd.f32 %v3726_v38, %v1906_v19  ;;  %v1865_v32 = vadd.f32 %v4038_v42, %v4052_v58  ;;  %v2404_v42 = vld [vmem:[%s4203_s3 + $0xc8] sm:$0xff] }
 0x46a   :  { %2028 = vmatpush.msrb.mxu0 %v1930_v48  ;;  %2441 = vmatpush.msra.mxu2 %v1930_v48 }
 0x46b   :  { %v1882_v5 = vpop.f32.mrf.mxu3 }
 0x46c   :  { %v1883_v4 = vadd.f32 %v1882_v5, %v1775_v43  ;;  %2029 = vmatpush.msrb.mxu0 %v1928_v47  ;;  %2442 = vmatpush.msra.mxu2 %v1928_v47  ;;  %v1871_v5 = vadd.f32 %v4042_v25, %v1755_v40 }
 0x46e   :  { %2635 = vtanh.f32 %v1883_v4  ;;  %2030 = vmatpush.msrb.mxu0 %v1926_v62  ;;  %2443 = vmatpush.msra.mxu2 %v1926_v62 }
 0x46f   :  { %2637 = vtanh.f32 %v1880_v45 }
 0x470   :  { %2031 = vmatpush.msrb.mxu0 %v1924_v33  ;;  %2444 = vmatpush.msra.mxu2 %v1924_v33  ;;  %v2405_v33 = vld [vmem:[%s4203_s3 + $0xd0] sm:$0xff] }
 0x472   :  { %2032 = vmatpush.msrb.mxu0 %v1922_v30  ;;  %2445 = vmatpush.msra.mxu2 %v1922_v30 }
 0x473   :  { %v1885_v53 = vpop.f32.mrf.mxu3 }
 0x474   :  { %v1886_v43 = vadd.f32 %v1885_v53, %v4044_v59  ;;  %v1920_v59 = vadd.f32 %v3722_v6, %v1904_v24  ;;  %v2636_v18 = vpop.eup %2635 }
 0x475   :  { %v2638_v25 = vpop.eup %2637  ;;  %v1917_v29 = vmul.f32 %v2636_v18, %v3877_v35  ;;  %v2408_v18 = vld [vmem:[%s4203_s3 + $0xe8] sm:$0xff] }
 0x476   :  { %2639 = vtanh.f32 %v1886_v43  ;;  %2033 = vmatpush.msrb.mxu0 %v1920_v59  ;;  %2446 = vmatpush.msra.mxu2 %v1920_v59  ;;  %v1915_v48 = vmul.f32 %v2638_v25, %v3886_v63  ;;  %v2407_v59 = vld [vmem:[%s4203_s3 + $0xe0] sm:$0xff] }
 0x477   :  { %2641 = vtanh.f32 %v1877_v8  ;;  %2419 = vmatmul.msk.f32.vlgmr.msrb.gmra.mxu0 %vm1357_vm12, %v2403_v9  ;;  %2426 = vmatmul.msk.f32.vlgmr.msra.gmra.mxu2 %vm1357_vm12, %v4078_v23  ;;  %v1933_v0 = vadd.f32 %v3846_v55, %v1917_v29  ;;  %v1957_v29 = vpop.permute.xlu0 %1956 }
 0x478   :  { %2643 = vtanh.f32 %v1874_v12  ;;  %v1931_v58 = vadd.f32 %v3837_v44, %v1915_v48  ;;  %v1967_v48 = vpop.permute.xlu2 %1966 }
 0x479   :  { %2645 = vtanh.f32 %v1871_v5  ;;  %v2406_v5 = vld [vmem:[%s4203_s3 + $0xd8] sm:$0xff] }
 0x47a   :  { %2647 = vtanh.f32 %v1868_v41  ;;  %v2409_v41 = vld [vmem:[%s4203_s3 + $0xf0] sm:$0xff]  ;;  %s2717_s3 = smov [#allocation5]  }
 0x47b   :  { %2649 = vtanh.f32 %v1865_v32  ;;  %s2249_s30 = sshll.u32 %s2717_s3, 4  ;;  %s2250_s30 = int_to_ptr.vmem [resolvable:$true] %s2249_s30 }
 0x47c   :  { %v2640_v40 = vpop.eup %2639 }
 0x47d   :  { %v1919_v36 = vmul.f32 %v2640_v40, %v3880_v7  ;;  %v2642_v13 = vpop.eup %2641 }
 0x47e   :  { %v2644_v60 = vpop.eup %2643  ;;  %v1913_v39 = vmul.f32 %v2642_v13, %v3891_v26  ;;  %v1962_v13 = vpop.permute.xlu1 %1961 }
 0x47f   :  { %v1935_v27 = vadd.f32 %v3855_v2, %v1919_v36  ;;  %v2646_v4 = vpop.eup %2645  ;;  %v1911_v47 = vmul.f32 %v2644_v60, %v3896_v14  ;;  %2420 = vmatmul.msk.f32.gmra.mxu0 %vm1357_vm12, %v2404_v42 }
 0x480   :  { %v2648_v50 = vpop.eup %2647  ;;  %v1929_v45 = vadd.f32 %v4232_v37, %v1913_v39  ;;  %v1909_v62 = vmul.f32 %v2646_v4, %v3904_v57 }
 0x481   :  { %2067 = vmatpush.msrb.mxu1 %v1935_v27  ;;  %v2650_v19 = vpop.eup %2649  ;;  %v1927_v53 = vadd.f32 %v4233_v10, %v1911_v47  ;;  %v1907_v24 = vmul.f32 %v2648_v50, %v3912_v22 }
 0x482   :  { %v1925_v8 = vadd.f32 %v4234_v34, %v1909_v62  ;;  %v1905_v43 = vmul.f32 %v2650_v19, %v3917_v3 }
 0x483   :  { %2068 = vmatpush.msrb.mxu1 %v1933_v0  ;;  %v1923_v12 = vadd.f32 %v4235_v52, %v1907_v24  ;;  %v1972_v0 = vpop.permute.xlu0 %1971 }
 0x484   :  { %v1921_v30 = vadd.f32 %v3909_v17, %v1905_v43 }
 0x485   :  { %2069 = vmatpush.msrb.mxu1 %v1931_v58 }
 0x486   :  { %v1977_v4 = vpop.permute.xlu1 %1976 }
 0x487   :  { %2070 = vmatpush.msrb.mxu1 %v1929_v45  ;;  %2421 = vmatmul.msk.f32.gmra.mxu0 %vm1357_vm12, %v2405_v33 }
 0x489   :  { %2071 = vmatpush.msrb.mxu1 %v1927_v53 }
 0x48b   :  { %2072 = vmatpush.msrb.mxu1 %v1925_v8  ;;  %v4138_v19 = vpop.permute.xlu0 %1986 }
 0x48d   :  { %2073 = vmatpush.msrb.mxu1 %v1923_v12 }
 0x48e   :  { %v4140_v24 = vpop.permute.xlu1 %1991 }
 0x48f   :  { %2074 = vmatpush.msrb.mxu1 %v1921_v30  ;;  %2422 = vmatmul.msk.f32.gmra.mxu0 %vm1357_vm12, %v2406_v5 }
 0x490   :  { %2427 = vmatmul.msk.f32.vlgmr.msrb.gmra.mxu1 %vm1357_vm12, %v2403_v9 }
 0x497   :  { %2423 = vmatmul.msk.f32.gmra.mxu0 %vm1357_vm12, %v2407_v59 }
 0x498   :  { %2428 = vmatmul.msk.f32.gmra.mxu1 %vm1357_vm12, %v2404_v42  ;;  %v1982_v42 = vpop.permute.xlu2 %1981 }
 0x49f   :  { %2424 = vmatmul.msk.f32.gmra.mxu0 %vm1357_vm12, %v2408_v18 }
 0x4a0   :  { %2429 = vmatmul.msk.f32.gmra.mxu1 %vm1357_vm12, %v2405_v33  ;;  %v4142_v12 = vpop.permute.xlu2 %2150 }
 0x4a7   :  { %2425 = vmatmul.msk.f32.gmra.mxu0 %vm1357_vm12, %v2409_v41 }
 0x4a8   :  { %2430 = vmatmul.msk.f32.gmra.mxu1 %vm1357_vm12, %v2406_v5 }
 0x4b0   :  { %2431 = vmatmul.msk.f32.gmra.mxu1 %vm1357_vm12, %v2407_v59 }
 0x4b8   :  { %2432 = vmatmul.msk.f32.gmra.mxu1 %vm1357_vm12, %v2408_v18 }
 0x4c0   :  { %2433 = vmatmul.msk.f32.gmra.mxu1 %vm1357_vm12, %v2409_v41 }
 0x4c8   :  { %2434 = vmatmul.msk.f32.gmra.mxu1 %vm1357_vm12, %v4078_v23 }
 0x4f4   :  { %v2035_v9 = vpop.f32.mrf.mxu0 }
 0x4f5   :  { %v2036_v50 = vadd.f32 %v2035_v9, %v1957_v29 }
 0x4fa   :  { %v2056_v18 = vpop.f32.mrf.mxu2 }
 0x4fc   :  { %v2038_v25 = vpop.f32.mrf.mxu0 }
 0x4fd   :  { %v2039_v58 = vadd.f32 %v2038_v25, %v1962_v13 }
 0x4ff   :  { %2651 = vtanh.f32 %v2039_v58 }
 0x500   :  { %2653 = vtanh.f32 %v2036_v50 }
 0x504   :  { %v2041_v40 = vpop.f32.mrf.mxu0 }
 0x505   :  { %v2042_v45 = vadd.f32 %v2041_v40, %v1967_v48  ;;  %v2652_v33 = vpop.eup %2651 }
 0x506   :  { %v2654_v5 = vpop.eup %2653  ;;  %v2118_v41 = vmul.f32 %v2652_v33, %v3830_v15  ;;  %v4153_v15 = vpop.permute.xlu1 %2160 }
 0x507   :  { %2655 = vtanh.f32 %v2042_v45  ;;  %v2116_v40 = vmul.f32 %v2654_v5, %v3840_v61  ;;  %v4158_v5 = vpop.permute.xlu2 %2165 }
 0x509   :  { %v2132_v33 = vadd.f32 %v3722_v6, %v2116_v40 }
 0x50c   :  { %v2044_v36 = vpop.f32.mrf.mxu0 }
 0x50d   :  { %v2076_v32 = vpop.f32.mrf.mxu1  ;;  %v2045_v23 = vadd.f32 %v2044_v36, %v1972_v0  ;;  %v2656_v59 = vpop.eup %2655  ;;  %v2057_v36 = vadd.f32 %v2056_v18, %v4140_v24 }
 0x50e   :  { %v2077_v45 = vadd.f32 %v2076_v32, %v1957_v29 }
 0x50f   :  { %2657 = vtanh.f32 %v2045_v23  ;;  %v2134_v23 = vadd.f32 %v3726_v38, %v2118_v41 }
 0x514   :  { %v2047_v60 = vpop.f32.mrf.mxu0 }
 0x515   :  { %v2079_v27 = vpop.f32.mrf.mxu1  ;;  %v2048_v53 = vadd.f32 %v2047_v60, %v1977_v4  ;;  %v2658_v25 = vpop.eup %2657  ;;  %v2120_v60 = vmul.f32 %v2656_v59, %v3823_v54 }
 0x516   :  { %v2080_v50 = vadd.f32 %v2079_v27, %v1962_v13  ;;  %v2188_v27 = vmul.f32 %v4142_v12, %v2132_v33 }
 0x517   :  { %2659 = vtanh.f32 %v2048_v53  ;;  %v2122_v53 = vmul.f32 %v2658_v25, %v3814_v51  ;;  %v2136_v61 = vadd.f32 %v3729_v20, %v2120_v60 }
 0x519   :  { %v2138_v51 = vadd.f32 %v3733_v31, %v2122_v53  ;;  %v2192_v20 = vmul.f32 %v4153_v15, %v2136_v61 }
 0x51b   :  { %v2194_v59 = vmul.f32 %v4158_v5, %v2138_v51 }
 0x51c   :  { %v2050_v47 = vpop.f32.mrf.mxu0 }
 0x51d   :  { %v2082_v39 = vpop.f32.mrf.mxu1  ;;  %v2051_v8 = vadd.f32 %v2050_v47, %v1982_v42  ;;  %v2660_v58 = vpop.eup %2659 }
 0x51e   :  { %v4149_v47 = vpop.permute.xlu0 %2155  ;;  %v2124_v54 = vmul.f32 %v2660_v58, %v3807_v49 }
 0x51f   :  { %2661 = vtanh.f32 %v2051_v8  ;;  %v2190_v38 = vmul.f32 %v4149_v47, %v2134_v23 }
 0x520   :  { %v2140_v49 = vadd.f32 %v3737_v28, %v2124_v54  ;;  %v2176_v28 = vpop.permute.xlu1 %2175 }
 0x524   :  { %v2053_v43 = vpop.f32.mrf.mxu0 }
 0x525   :  { %v2085_v62 = vpop.f32.mrf.mxu1  ;;  %v2054_v30 = vadd.f32 %v2053_v43, %v4138_v19  ;;  %v2662_v8 = vpop.eup %2661  ;;  %v2083_v43 = vadd.f32 %v2082_v39, %v1967_v48 }
 0x526   :  { %v2086_v32 = vadd.f32 %v2085_v62, %v1972_v0  ;;  %v2126_v13 = vmul.f32 %v2662_v8, %v3800_v21  ;;  %v2204_v62 = vadd.f32 %v2190_v38, %v2188_v27  ;;  %v2171_v21 = vpop.permute.xlu0 %2170 }
 0x527   :  { %2663 = vtanh.f32 %v2054_v30 }
 0x528   :  { %2665 = vtanh.f32 %v2057_v36  ;;  %v2142_v31 = vadd.f32 %v3749_v56, %v2126_v13  ;;  %v2205_v41 = vadd.f32 %v2204_v62, %v2192_v20  ;;  %v2181_v56 = vpop.permute.xlu2 %2180 }
 0x529   :  { %2667 = vtanh.f32 %v2080_v50 }
 0x52a   :  { %2669 = vtanh.f32 %v2077_v45  ;;  %v2206_v36 = vadd.f32 %v2205_v41, %v2194_v59  ;;  %v2198_v58 = vmul.f32 %v2176_v28, %v2142_v31 }
 0x52b   :  { %2671 = vtanh.f32 %v2083_v43 }
 0x52c   :  { %2673 = vtanh.f32 %v2086_v32 }
 0x52d   :  { %v2088_v9 = vpop.f32.mrf.mxu1  ;;  %v2664_v30 = vpop.eup %2663 }
 0x52e   :  { %v2089_v6 = vadd.f32 %v2088_v9, %v1977_v4  ;;  %v2128_v48 = vmul.f32 %v2664_v30, %v3790_v1  ;;  %v2666_v39 = vpop.eup %2665  ;;  %v2196_v9 = vmul.f32 %v2171_v21, %v2140_v49 }
 0x52f   :  { %v2668_v18 = vpop.eup %2667 }
 0x530   :  { %2675 = vtanh.f32 %v2089_v6  ;;  %v2670_v4 = vpop.eup %2669  ;;  %v2144_v25 = vadd.f32 %v3757_v16, %v2128_v48  ;;  %v2119_v1 = vmul.f32 %v2668_v18, %v3912_v22  ;;  %v2207_v8 = vadd.f32 %v2206_v36, %v2196_v9 }
 0x531   :  { %v2672_v40 = vpop.eup %2671  ;;  %v2117_v45 = vmul.f32 %v2670_v4, %v3917_v3 }
 0x532   :  { %v2674_v50 = vpop.eup %2673  ;;  %v2121_v53 = vmul.f32 %v2672_v40, %v3904_v57  ;;  %v2200_v16 = vmul.f32 %v2181_v56, %v2144_v25  ;;  %v2135_v33 = vadd.f32 %v4235_v52, %v2119_v1  ;;  %v2208_v61 = vadd.f32 %v2207_v8, %v2198_v58  ;;  %v2186_v57 = vpop.permute.xlu0 %2185 }
 0x533   :  { %v2133_v30 = vadd.f32 %v3909_v17, %v2117_v45 }
 0x534   :  { %v2137_v3 = vadd.f32 %v4234_v34, %v2121_v53  ;;  %v2209_v32 = vadd.f32 %v2208_v61, %v2200_v16  ;;  %v2191_v38 = vmul.f32 %v4149_v47, %v2135_v33 }
 0x535   :  { %v2091_v29 = vpop.f32.mrf.mxu1 }
 0x536   :  { %v2092_v0 = vadd.f32 %v2091_v29, %v1982_v42  ;;  %v2130_v42 = vmul.f32 %v2666_v39, %v3793_v11  ;;  %v2676_v43 = vpop.eup %2675  ;;  %v2123_v11 = vmul.f32 %v2674_v50, %v3896_v14  ;;  %v2189_v14 = vmul.f32 %v4142_v12, %v2133_v30 }
 0x537   :  { %v2193_v17 = vmul.f32 %v4153_v15, %v2137_v3 }
 0x538   :  { %2677 = vtanh.f32 %v2092_v0  ;;  %v2146_v22 = vadd.f32 %v3763_v46, %v2130_v42  ;;  %v2139_v29 = vadd.f32 %v4233_v10, %v2123_v11  ;;  %v2217_v47 = vadd.f32 %v2191_v38, %v2189_v14 }
 0x53a   :  { %v2202_v51 = vmul.f32 %v2186_v57, %v2146_v22  ;;  %v2195_v20 = vmul.f32 %v4158_v5, %v2139_v29 }
 0x53c   :  { %v2210_v27 = vadd.f32 %v2209_v32, %v2202_v51 }
 0x53d   :  { %v2094_v60 = vpop.f32.mrf.mxu1 }
 0x53e   :  { %v2095_v23 = vadd.f32 %v2094_v60, %v4138_v19  ;;  %v2678_v54 = vpop.eup %2677  ;;  %v2125_v19 = vmul.f32 %v2676_v43, %v3891_v26  ;;  %v2211_v12 = vrot.slane %v2210_v27, 4 }
 0x53f   :  { %v2127_v52 = vmul.f32 %v2678_v54, %v3886_v63  ;;  %v2218_v63 = vadd.f32 %v2217_v47, %v2193_v17 }
 0x540   :  { %2679 = vtanh.f32 %v2095_v23  ;;  %v2141_v34 = vadd.f32 %v4232_v37, %v2125_v19 }
 0x541   :  { %v2143_v10 = vadd.f32 %v3837_v44, %v2127_v52  ;;  %v2219_v0 = vadd.f32 %v2218_v63, %v2195_v20 }
 0x542   :  { %v2197_v49 = vmul.f32 %v2171_v21, %v2141_v34 }
 0x544   :  { %v2220_v15 = vadd.f32 %v2219_v0, %v2197_v49 }
 0x545   :  { %v2097_v46 = vpop.f32.mrf.mxu1 }
 0x546   :  { %v2680_v13 = vpop.eup %2679  ;;  %v2098_v6 = vadd.f32 %v2097_v46, %v4140_v24  ;;  %v2199_v24 = vmul.f32 %v2176_v28, %v2143_v10  ;;  %v2233_v28 = vpop.permute.xlu1 %2232 }
 0x547   :  { %v2129_v26 = vmul.f32 %v2680_v13, %v3877_v35  ;;  %v2212_v35 = vadd.f32 %v2211_v12, %v2210_v27  ;;  %v2235_v36 = vperm.slane %v2233_v28, 0 }
 0x548   :  { %2681 = vtanh.f32 %v2098_v6  ;;  %v2221_v59 = vadd.f32 %v2220_v15, %v2199_v24 }
 0x549   :  { %v2145_v48 = vadd.f32 %v3846_v55, %v2129_v26  ;;  %v2213_v4 = vrot.slane %v2212_v35, 2 }
 0x54b   :  { %v2201_v62 = vmul.f32 %v2181_v56, %v2145_v48  ;;  %v2214_v21 = vadd.f32 %v2213_v4, %v2212_v35 }
 0x54d   :  { %v2222_v18 = vadd.f32 %v2221_v59, %v2201_v62  ;;  %v2215_v55 = vrot.slane %v2214_v21, 1 }
 0x54e   :  { %v2682_v39 = vpop.eup %2681 }
 0x54f   :  { %v2131_v37 = vmul.f32 %v2682_v39, %v3880_v7  ;;  %v2216_v1 = vadd.f32 %v2215_v55, %v2214_v21 }
 0x551   :  { %v2147_v31 = vadd.f32 %v3855_v2, %v2131_v37  ;;  %v2236_v7 = vadd.f32 %v2235_v36, %v2216_v1 }
 0x553   :  { %v2203_v5 = vmul.f32 %v2186_v57, %v2147_v31 }
 0x555   :  { %v2223_v44 = vadd.f32 %v2222_v18, %v2203_v5 }
 0x557   :  { %v2224_v41 = vrot.slane %v2223_v44, 4 }
 0x559   :  { %v2225_v9 = vadd.f32 %v2224_v41, %v2223_v44 }
 0x55b   :  { %v2226_v25 = vrot.slane %v2225_v9, 2 }
 0x55d   :  { %v2227_v40 = vadd.f32 %v2226_v25, %v2225_v9 }
 0x55f   :  { %v2228_v42 = vrot.slane %v2227_v40, 1 }
 0x561   :  { %v2229_v60 = vadd.f32 %v2228_v42, %v2227_v40 }
 0x563   :  { %v2237_v58 = vadd.f32 %v2235_v36, %v2229_v60 }
 0x565   :  { %v2240_v2 = vrot.slane %v2237_v58, 7 }
 0x567   :  { %v2241_v50 = vsel %vm692_vm8, %v2236_v7, %v2240_v2 }
 0x568   :  { %2243 = vst.msk [vmem:[#allocation5] sm:$0x3] %vm3251_vm4, %v2241_v50 }
 0x569   :  { %2254 = dma.vmem_to_hbm [thread:$0]  %s2250_s30, 32, %s2252_s10, [#allocation6]  }
 0x56a   :  { %2707 = dma.done.wait [#allocation6], 32  }
 0x56b   :  { %2708 = vsyncadd [#allocation6], 4294967264 }
 0x56c   :  { %2259 = vsyncpa [#allocation6], 1 }

</bundles_post_ra>
